<compile_context>
chip_gen: v7x
topology: tpu7x:2x2x1
jax: 0.10.0
libtpu: 0.0.40
codegen_flags: <defaults>
</compile_context>

<pallas_src>
import functools
import math

import jax
import jax.numpy as jnp
from jax.experimental import pallas as pl
from jax.experimental.pallas import tpu as pltpu

EPS = 1e-5


def encoder_block_kernel(x_ref, wqkv_ref, wo_ref, bqkv_ref, bo_ref,
                         g1_ref, be1_ref,
                         w1_ref, bf1_ref, w2_ref, bf2_ref,
                         g2_ref, be2_ref,
                         o_ref, *, num_heads):
    Bt, S, E = x_ref.shape
    M = Bt * S
    hd = E // num_heads

    # Flatten the batch tile so projections / FFN / LayerNorms run with a
    # large M dimension on the MXU.
    x = x_ref[...].reshape(M, E)                          # f32
    x_bf = x.astype(jnp.bfloat16)

    # Fused QKV projection (1/sqrt(hd) pre-folded into Wq/bq by prepare_params).
    qkv = jnp.dot(x_bf, wqkv_ref[...],
                  preferred_element_type=jnp.float32) + bqkv_ref[...]
    # One f32->bf16 cast; the f32 (M, 3E) tensor is dead after this line.
    qkv_bf = qkv.astype(jnp.bfloat16).reshape(Bt, S, 3 * E)

    # Attention: heads unrolled, batch handled by the einsum batch dimension.
    # Each head's context is contracted directly against its Wo rows and
    # accumulated -> no ctx scratch, no masked 32-lane column stores.
    attn = jnp.zeros((M, E), jnp.float32)
    for h in range(num_heads):
        lo = h * hd
        qh = qkv_bf[:, :, lo:lo + hd]                     # (Bt, S, hd) bf16
        kh = qkv_bf[:, :, E + lo:E + lo + hd]
        vh = qkv_bf[:, :, 2 * E + lo:2 * E + lo + hd]
        s = jnp.einsum("bqd,bkd->bqk", qh, kh,
                       preferred_element_type=jnp.float32)  # (Bt, S, S) f32
        m = jnp.max(s, axis=-1, keepdims=True)
        p = jnp.exp(s - m)
        denom = jnp.sum(p, axis=-1, keepdims=True)
        p = (p * pl.reciprocal(denom, approx=True)).astype(jnp.bfloat16)
        ctx_h = jnp.einsum("bqk,bkd->bqd", p, vh,
                           preferred_element_type=jnp.float32)  # (Bt, S, hd)
        attn = attn + jnp.dot(ctx_h.reshape(M, hd).astype(jnp.bfloat16),
                              wo_ref[lo:lo + hd, :],
                              preferred_element_type=jnp.float32)
    attn = attn + bo_ref[...]

    # Residual + LayerNorm 1 (f32).
    x1 = x + attn
    mu1 = jnp.mean(x1, axis=-1, keepdims=True)
    xc1 = x1 - mu1
    var1 = jnp.mean(xc1 * xc1, axis=-1, keepdims=True)
    x1n = xc1 * jax.lax.rsqrt(var1 + EPS) * g1_ref[...] + be1_ref[...]

    # FeedForward: Linear -> ReLU -> Linear (bf16 matmuls, f32 accumulation).
    h1 = jnp.dot(x1n.astype(jnp.bfloat16), w1_ref[...],
                 preferred_element_type=jnp.float32) + bf1_ref[...]
    h1 = jnp.maximum(h1, 0.0)
    ff = jnp.dot(h1.astype(jnp.bfloat16), w2_ref[...],
                 preferred_element_type=jnp.float32) + bf2_ref[...]

    # Residual + LayerNorm 2 (f32).
    x2 = x1n + ff
    mu2 = jnp.mean(x2, axis=-1, keepdims=True)
    xc2 = x2 - mu2
    var2 = jnp.mean(xc2 * xc2, axis=-1, keepdims=True)
    y = xc2 * jax.lax.rsqrt(var2 + EPS) * g2_ref[...] + be2_ref[...]

    o_ref[...] = y.reshape(Bt, S, E).astype(o_ref.dtype)


def prepare_params(params, *, num_heads):
    """One-time parameter preparation (call once, reuse across calls):
    fold 1/sqrt(hd) into Wq/bq, fuse QKV weights, cast matmul weights to bf16.
    Keeping this out of the per-call wrapper avoids re-reading/re-writing all
    weights in HBM on every invocation."""
    E = params["wq"].shape[0]
    hd = E // num_heads
    scale = 1.0 / math.sqrt(hd)
    wqkv = jnp.concatenate(
        [params["wq"] * scale, params["wk"], params["wv"]],
        axis=1).astype(jnp.bfloat16)
    bqkv = jnp.concatenate(
        [params["bq"] * scale, params["bk"], params["bv"]],
        axis=1).astype(jnp.float32)
    return {
        "wqkv": wqkv, "bqkv": bqkv,
        "wo": params["wo"].astype(jnp.bfloat16), "bo": params["bo"],
        "g1": params["g1"], "be1": params["be1"],
        "w1": params["w1"].astype(jnp.bfloat16), "bf1": params["bf1"],
        "w2": params["w2"].astype(jnp.bfloat16), "bf2": params["bf2"],
        "g2": params["g2"], "be2": params["be2"],
    }


def _vmem_limit_bytes():
    cap = 64 * 1024 * 1024                # conservative fallback (v7x VMEM)
    try:
        cap = int(pltpu.get_tpu_info().vmem_capacity_bytes)
    except Exception:
        pass
    # ~75% of physical VMEM: ~96-100 MiB on v5e/v6e (128 MiB), ~48 MiB on v7x.
    return int(min(cap * 3 // 4, 100 * 1024 * 1024))


def _choose_batch_tile(B, S, E, FF, vmem_limit, target_rows=512):
    """~512-row batch tiles (near HBM roofline), at least 2 grid steps when
    reasonable (v7x dual TensorCore), shrunk if per-tile activations plus
    resident weights would exceed the VMEM budget."""
    bt = max(1, min(B, target_rows // max(S, 1)))
    half_b = (B + 1) // 2
    if B >= 2 and (half_b * S >= 256 or B * S <= 512):
        bt = min(bt, half_b)

    weight_bytes = 2 * (3 * E * E + E * E + E * FF + FF * E)   # bf16 weights

    def tile_act_bytes(b):
        m = b * S
        # x in/out (double-buffered) + f32 qkv + FFN hidden + E-wide f32 temps.
        return 4 * m * (4 * E + 3 * E + FF + 6 * E)

    budget = vmem_limit // 2
    # TODO(synk): request single-buffered weight blocks (pipeline_mode=
    # pl.Buffered(1)) once universally available; the 2x below assumes
    # double-buffered weight windows.
    while bt > 1 and tile_act_bytes(bt) + 2 * weight_bytes > budget:
        bt = max(1, bt // 2)
    return bt


def encoder_block(x, prep, *, num_heads):
    B, S, E = x.shape
    FF = prep["w1"].shape[1]
    assert E % num_heads == 0

    vmem_limit = _vmem_limit_bytes()
    bt = _choose_batch_tile(B, S, E, FF, vmem_limit)

    # Pad the batch to a multiple of the tile instead of collapsing bt to 1
    # for awkward B.  Zero padding rows are numerically harmless (uniform
    # softmax, finite LayerNorm) and are sliced off below.
    n_tiles = pl.cdiv(B, bt)
    Bp = n_tiles * bt
    if Bp != B:
        x = jnp.pad(x, ((0, Bp - B), (0, 0), (0, 0)))

    def rep(shape):
        n = len(shape)
        return pl.BlockSpec(shape, lambda i, n=n: (0,) * n)

    in_specs = [
        pl.BlockSpec((bt, S, E), lambda i: (i, 0, 0)),   # x (batch tile)
        rep((E, 3 * E)),                                 # fused Wqkv (bf16)
        rep((E, E)),                                     # Wo (bf16)
        rep((1, 3 * E)), rep((1, E)),                    # bqkv, bo (f32)
        rep((1, E)), rep((1, E)),                        # LN1 gamma, beta
        rep((E, FF)), rep((1, FF)),                      # W1 (bf16), b1
        rep((FF, E)), rep((1, E)),                       # W2 (bf16), b2
        rep((1, E)), rep((1, E)),                        # LN2 gamma, beta
    ]
    out_spec = pl.BlockSpec((bt, S, E), lambda i: (i, 0, 0))

    kernel = functools.partial(encoder_block_kernel, num_heads=num_heads)
    out = pl.pallas_call(
        kernel,
        out_shape=jax.ShapeDtypeStruct((Bp, S, E), jnp.float32),
        grid=(n_tiles,),
        in_specs=in_specs,
        out_specs=out_spec,
        compiler_params=pltpu.CompilerParams(
            dimension_semantics=("parallel",),           # batch tiles independent
            vmem_limit_bytes=vmem_limit),
    )(x, prep["wqkv"], prep["wo"], prep["bqkv"], prep["bo"],
      prep["g1"], prep["be1"],
      prep["w1"], prep["bf1"], prep["w2"], prep["bf2"],
      prep["g2"], prep["be2"])
    return out[:B] if Bp != B else out


def reference_encoder_block(x, params, *, num_heads):
    """Pure-JAX f32 reference (same math as the torch module)."""
    B, S, E = x.shape
    hd = E // num_heads
    scale = 1.0 / jnp.sqrt(jnp.float32(hd))

    q = x @ params["wq"] + params["bq"]
    k = x @ params["wk"] + params["bk"]
    v = x @ params["wv"] + params["bv"]
    qh = q.reshape(B, S, num_heads, hd).transpose(0, 2, 1, 3)
    kh = k.reshape(B, S, num_heads, hd).transpose(0, 2, 1, 3)
    vh = v.reshape(B, S, num_heads, hd).transpose(0, 2, 1, 3)
    scores = jnp.einsum("bhqd,bhkd->bhqk", qh, kh) * scale
    p = jax.nn.softmax(scores, axis=-1)
    ctx = jnp.einsum("bhqk,bhkd->bhqd", p, vh).transpose(0, 2, 1, 3).reshape(B, S, E)
    attn = ctx @ params["wo"] + params["bo"]

    x1 = x + attn
    mu = jnp.mean(x1, -1, keepdims=True)
    var = jnp.mean((x1 - mu) ** 2, -1, keepdims=True)
    x1n = (x1 - mu) * jax.lax.rsqrt(var + EPS) * params["g1"] + params["be1"]

    h = jnp.maximum(x1n @ params["w1"] + params["bf1"], 0.0)
    ff = h @ params["w2"] + params["bf2"]
    x2 = x1n + ff
    mu2 = jnp.mean(x2, -1, keepdims=True)
    var2 = jnp.mean((x2 - mu2) ** 2, -1, keepdims=True)
    return (x2 - mu2) * jax.lax.rsqrt(var2 + EPS) * params["g2"] + params["be2"]


def init_params(key, embed_dim, ff_dim):
    ks = jax.random.split(key, 8)
    s = 0.05
    return {
        # attention projection weights stored already transposed -> x @ W
        "wq": jax.random.normal(ks[0], (embed_dim, embed_dim), jnp.float32) * s,
        "wk": jax.random.normal(ks[1], (embed_dim, embed_dim), jnp.float32) * s,
        "wv": jax.random.normal(ks[2], (embed_dim, embed_dim), jnp.float32) * s,
        "wo": jax.random.normal(ks[3], (embed_dim, embed_dim), jnp.float32) * s,
        "bq": jax.random.normal(ks[4], (1, embed_dim), jnp.float32) * s,
        "bk": jax.random.normal(ks[5], (1, embed_dim), jnp.float32) * s,
        "bv": jax.random.normal(ks[6], (1, embed_dim), jnp.float32) * s,
        "bo": jnp.zeros((1, embed_dim), jnp.float32),
        # LayerNorm params (torch default: gamma=1, beta=0)
        "g1": jnp.ones((1, embed_dim), jnp.float32),
        "be1": jnp.zeros((1, embed_dim), jnp.float32),
        "g2": jnp.ones((1, embed_dim), jnp.float32),
        "be2": jnp.zeros((1, embed_dim), jnp.float32),
        # FeedForward
        "w1": jax.random.normal(ks[7], (embed_dim, ff_dim), jnp.float32) * s,
        "bf1": jnp.zeros((1, ff_dim), jnp.float32),
        "w2": jax.random.normal(jax.random.fold_in(key, 99),
                                (ff_dim, embed_dim), jnp.float32) * s,
        "bf2": jnp.zeros((1, embed_dim), jnp.float32),
    }


if __name__ == "__main__":
    B, S, E, H, FF = 2, 8, 256, 8, 512
    key = jax.random.PRNGKey(0)
    kx, kp = jax.random.split(key)
    x = jax.random.normal(kx, (B, S, E), jnp.float32)
    params = init_params(kp, E, FF)

    prep = prepare_params(params, num_heads=H)   # one-time weight fusion/casts
    out = encoder_block(x, prep, num_heads=H)
    out = jax.block_until_ready(out)

    ref = reference_encoder_block(x, params, num_heads=H)
    assert out.shape == (B, S, E)
    # bf16 matmul inputs (f32 accumulation) -> loosened tolerance vs f32 ref.
    assert jnp.allclose(out, ref, atol=5e-2, rtol=5e-2), "mismatch vs reference"
    print("KERNEL_OK")
</pallas_src>

<mosaic_0001>
module attributes {stable_mosaic.version = 11 : i64} {
  func.func @encoder_block_kernel(%arg0: i32, %arg1: memref<1x8x256xf32, #tpu.memory_space<vmem>>, %arg2: memref<256x768xbf16, #tpu.memory_space<vmem>>, %arg3: memref<256x256xbf16, #tpu.memory_space<vmem>>, %arg4: memref<1x768xf32, #tpu.memory_space<vmem>>, %arg5: memref<1x256xf32, #tpu.memory_space<vmem>>, %arg6: memref<1x256xf32, #tpu.memory_space<vmem>>, %arg7: memref<1x256xf32, #tpu.memory_space<vmem>>, %arg8: memref<256x512xbf16, #tpu.memory_space<vmem>>, %arg9: memref<1x512xf32, #tpu.memory_space<vmem>>, %arg10: memref<512x256xbf16, #tpu.memory_space<vmem>>, %arg11: memref<1x256xf32, #tpu.memory_space<vmem>>, %arg12: memref<1x256xf32, #tpu.memory_space<vmem>>, %arg13: memref<1x256xf32, #tpu.memory_space<vmem>>, %arg14: memref<1x8x256xf32, #tpu.memory_space<vmem>>) attributes {dimension_semantics = [#tpu.dimension_semantics<parallel>], iteration_bounds = array<i64: 2>, scalar_prefetch = 0 : i64, scratch_operands = 0 : i64, tpu.core_type = #tpu.core_type<tc>, window_params = [{transform_indices = @transform_0, window_bounds = array<i64: 1, 8, 256>}, {pipeline_mode = #tpu.pipeline_mode<synchronous>, transform_indices = @transform_1, window_bounds = array<i64: 256, 768>}, {pipeline_mode = #tpu.pipeline_mode<synchronous>, transform_indices = @transform_2, window_bounds = array<i64: 256, 256>}, {pipeline_mode = #tpu.pipeline_mode<synchronous>, transform_indices = @transform_3, window_bounds = array<i64: 1, 768>}, {pipeline_mode = #tpu.pipeline_mode<synchronous>, transform_indices = @transform_4, window_bounds = array<i64: 1, 256>}, {pipeline_mode = #tpu.pipeline_mode<synchronous>, transform_indices = @transform_5, window_bounds = array<i64: 1, 256>}, {pipeline_mode = #tpu.pipeline_mode<synchronous>, transform_indices = @transform_6, window_bounds = array<i64: 1, 256>}, {pipeline_mode = #tpu.pipeline_mode<synchronous>, transform_indices = @transform_7, window_bounds = array<i64: 256, 512>}, {pipeline_mode = #tpu.pipeline_mode<synchronous>, transform_indices = @transform_8, window_bounds = array<i64: 1, 512>}, {pipeline_mode = #tpu.pipeline_mode<synchronous>, transform_indices = @transform_9, window_bounds = array<i64: 512, 256>}, {pipeline_mode = #tpu.pipeline_mode<synchronous>, transform_indices = @transform_10, window_bounds = array<i64: 1, 256>}, {pipeline_mode = #tpu.pipeline_mode<synchronous>, transform_indices = @transform_11, window_bounds = array<i64: 1, 256>}, {pipeline_mode = #tpu.pipeline_mode<synchronous>, transform_indices = @transform_12, window_bounds = array<i64: 1, 256>}, {transform_indices = @transform_13, window_bounds = array<i64: 1, 8, 256>}]} {
    %c0 = arith.constant 0 : index
    %c0_0 = arith.constant 0 : index
    %c0_1 = arith.constant 0 : index
    %0 = vector.load %arg1[%c0, %c0_0, %c0_1] : memref<1x8x256xf32, #tpu.memory_space<vmem>>, vector<1x8x256xf32>
    %1 = vector.shape_cast %0 : vector<1x8x256xf32> to vector<8x256xf32>
    %2 = arith.truncf %1 : vector<8x256xf32> to vector<8x256xbf16>
    %c0_2 = arith.constant 0 : index
    %c0_3 = arith.constant 0 : index
    %3 = vector.load %arg2[%c0_2, %c0_3] : memref<256x768xbf16, #tpu.memory_space<vmem>>, vector<256x768xbf16>
    %cst = arith.constant dense<0.000000e+00> : vector<8x768xf32>
    %4 = tpu.matmul %2, %3, %cst {dimension_numbers = #tpu.dot_dimension_numbers<[1], [0], [0], [1], [0, 0, 1, 1], [], []>} : vector<8x256xbf16>, vector<256x768xbf16>, vector<8x768xf32> -> vector<8x768xf32>
    %c0_4 = arith.constant 0 : index
    %c0_5 = arith.constant 0 : index
    %5 = vector.load %arg4[%c0_4, %c0_5] : memref<1x768xf32, #tpu.memory_space<vmem>>, vector<1x768xf32>
    %6 = vector.broadcast %5 : vector<1x768xf32> to vector<8x768xf32>
    %7 = arith.addf %4, %6 : vector<8x768xf32>
    %8 = arith.truncf %7 : vector<8x768xf32> to vector<8x768xbf16>
    %9 = vector.shape_cast %8 : vector<8x768xbf16> to vector<1x8x768xbf16>
    %cst_6 = arith.constant 0.000000e+00 : f32
    %10 = vector.broadcast %cst_6 : f32 to vector<8x256xf32>
    %11 = vector.extract_strided_slice %9 {offsets = [0, 0, 0], sizes = [1, 8, 32], strides = [1, 1, 1]} : vector<1x8x768xbf16> to vector<1x8x32xbf16>
    %12 = vector.extract_strided_slice %9 {offsets = [0, 0, 256], sizes = [1, 8, 32], strides = [1, 1, 1]} : vector<1x8x768xbf16> to vector<1x8x32xbf16>
    %13 = vector.extract_strided_slice %9 {offsets = [0, 0, 512], sizes = [1, 8, 32], strides = [1, 1, 1]} : vector<1x8x768xbf16> to vector<1x8x32xbf16>
    "tpu.trace_start"() <{level = 10 : i32, message = "bqd,bkd->bqk"}> : () -> ()
    %cst_7 = arith.constant dense<0.000000e+00> : vector<1x8x8xf32>
    %14 = tpu.matmul %11, %12, %cst_7 {dimension_numbers = #tpu.dot_dimension_numbers<[2], [2], [1], [1], [0, 0, 0, 1, 1, 1], [0], [0]>} : vector<1x8x32xbf16>, vector<1x8x32xbf16>, vector<1x8x8xf32> -> vector<1x8x8xf32>
    "tpu.trace_stop"() : () -> ()
    %cst_8 = arith.constant dense<0xFF800000> : vector<1x8xf32>
    %15 = vector.multi_reduction <maximumf>, %14, %cst_8 [2] : vector<1x8x8xf32> to vector<1x8xf32>
    %16 = vector.shape_cast %15 : vector<1x8xf32> to vector<1x8x1xf32>
    %17 = vector.broadcast %16 : vector<1x8x1xf32> to vector<1x8x8xf32>
    %18 = arith.subf %14, %17 : vector<1x8x8xf32>
    %19 = math.exp %18 : vector<1x8x8xf32>
    %cst_9 = arith.constant dense<0.000000e+00> : vector<1x8xf32>
    %20 = vector.multi_reduction <add>, %19, %cst_9 [2] : vector<1x8x8xf32> to vector<1x8xf32>
    %21 = vector.shape_cast %20 : vector<1x8xf32> to vector<1x8x1xf32>
    %22 = tpu.reciprocal %21 {approx = true} : vector<1x8x1xf32> -> vector<1x8x1xf32>
    %23 = vector.broadcast %22 : vector<1x8x1xf32> to vector<1x8x8xf32>
    %24 = arith.mulf %19, %23 : vector<1x8x8xf32>
    %25 = arith.truncf %24 : vector<1x8x8xf32> to vector<1x8x8xbf16>
    "tpu.trace_start"() <{level = 10 : i32, message = "bqk,bkd->bqd"}> : () -> ()
    %cst_10 = arith.constant dense<0.000000e+00> : vector<1x8x32xf32>
    %26 = tpu.matmul %25, %13, %cst_10 {dimension_numbers = #tpu.dot_dimension_numbers<[2], [1], [1], [2], [0, 0, 0, 1, 1, 2], [0], [0]>} : vector<1x8x8xbf16>, vector<1x8x32xbf16>, vector<1x8x32xf32> -> vector<1x8x32xf32>
    "tpu.trace_stop"() : () -> ()
    %27 = vector.shape_cast %26 : vector<1x8x32xf32> to vector<8x32xf32>
    %28 = arith.truncf %27 : vector<8x32xf32> to vector<8x32xbf16>
    %c0_11 = arith.constant 0 : index
    %c0_12 = arith.constant 0 : index
    %29 = vector.load %arg3[%c0_11, %c0_12] : memref<256x256xbf16, #tpu.memory_space<vmem>>, vector<32x256xbf16>
    %cst_13 = arith.constant dense<0.000000e+00> : vector<8x256xf32>
    %30 = tpu.matmul %28, %29, %cst_13 {dimension_numbers = #tpu.dot_dimension_numbers<[1], [0], [0], [1], [0, 0, 1, 1], [], []>} : vector<8x32xbf16>, vector<32x256xbf16>, vector<8x256xf32> -> vector<8x256xf32>
    %31 = arith.addf %10, %30 : vector<8x256xf32>
    %32 = vector.extract_strided_slice %9 {offsets = [0, 0, 32], sizes = [1, 8, 32], strides = [1, 1, 1]} : vector<1x8x768xbf16> to vector<1x8x32xbf16>
    %33 = vector.extract_strided_slice %9 {offsets = [0, 0, 288], sizes = [1, 8, 32], strides = [1, 1, 1]} : vector<1x8x768xbf16> to vector<1x8x32xbf16>
    %34 = vector.extract_strided_slice %9 {offsets = [0, 0, 544], sizes = [1, 8, 32], strides = [1, 1, 1]} : vector<1x8x768xbf16> to vector<1x8x32xbf16>
    "tpu.trace_start"() <{level = 10 : i32, message = "bqd,bkd->bqk"}> : () -> ()
    %cst_14 = arith.constant dense<0.000000e+00> : vector<1x8x8xf32>
    %35 = tpu.matmul %32, %33, %cst_14 {dimension_numbers = #tpu.dot_dimension_numbers<[2], [2], [1], [1], [0, 0, 0, 1, 1, 1], [0], [0]>} : vector<1x8x32xbf16>, vector<1x8x32xbf16>, vector<1x8x8xf32> -> vector<1x8x8xf32>
    "tpu.trace_stop"() : () -> ()
    %cst_15 = arith.constant dense<0xFF800000> : vector<1x8xf32>
    %36 = vector.multi_reduction <maximumf>, %35, %cst_15 [2] : vector<1x8x8xf32> to vector<1x8xf32>
    %37 = vector.shape_cast %36 : vector<1x8xf32> to vector<1x8x1xf32>
    %38 = vector.broadcast %37 : vector<1x8x1xf32> to vector<1x8x8xf32>
    %39 = arith.subf %35, %38 : vector<1x8x8xf32>
    %40 = math.exp %39 : vector<1x8x8xf32>
    %cst_16 = arith.constant dense<0.000000e+00> : vector<1x8xf32>
    %41 = vector.multi_reduction <add>, %40, %cst_16 [2] : vector<1x8x8xf32> to vector<1x8xf32>
    %42 = vector.shape_cast %41 : vector<1x8xf32> to vector<1x8x1xf32>
    %43 = tpu.reciprocal %42 {approx = true} : vector<1x8x1xf32> -> vector<1x8x1xf32>
    %44 = vector.broadcast %43 : vector<1x8x1xf32> to vector<1x8x8xf32>
    %45 = arith.mulf %40, %44 : vector<1x8x8xf32>
    %46 = arith.truncf %45 : vector<1x8x8xf32> to vector<1x8x8xbf16>
    "tpu.trace_start"() <{level = 10 : i32, message = "bqk,bkd->bqd"}> : () -> ()
    %cst_17 = arith.constant dense<0.000000e+00> : vector<1x8x32xf32>
    %47 = tpu.matmul %46, %34, %cst_17 {dimension_numbers = #tpu.dot_dimension_numbers<[2], [1], [1], [2], [0, 0, 0, 1, 1, 2], [0], [0]>} : vector<1x8x8xbf16>, vector<1x8x32xbf16>, vector<1x8x32xf32> -> vector<1x8x32xf32>
    "tpu.trace_stop"() : () -> ()
    %48 = vector.shape_cast %47 : vector<1x8x32xf32> to vector<8x32xf32>
    %49 = arith.truncf %48 : vector<8x32xf32> to vector<8x32xbf16>
    %c32 = arith.constant 32 : index
    %c0_18 = arith.constant 0 : index
    %50 = vector.load %arg3[%c32, %c0_18] : memref<256x256xbf16, #tpu.memory_space<vmem>>, vector<32x256xbf16>
    %cst_19 = arith.constant dense<0.000000e+00> : vector<8x256xf32>
    %51 = tpu.matmul %49, %50, %cst_19 {dimension_numbers = #tpu.dot_dimension_numbers<[1], [0], [0], [1], [0, 0, 1, 1], [], []>} : vector<8x32xbf16>, vector<32x256xbf16>, vector<8x256xf32> -> vector<8x256xf32>
    %52 = arith.addf %31, %51 : vector<8x256xf32>
    %53 = vector.extract_strided_slice %9 {offsets = [0, 0, 64], sizes = [1, 8, 32], strides = [1, 1, 1]} : vector<1x8x768xbf16> to vector<1x8x32xbf16>
    %54 = vector.extract_strided_slice %9 {offsets = [0, 0, 320], sizes = [1, 8, 32], strides = [1, 1, 1]} : vector<1x8x768xbf16> to vector<1x8x32xbf16>
    %55 = vector.extract_strided_slice %9 {offsets = [0, 0, 576], sizes = [1, 8, 32], strides = [1, 1, 1]} : vector<1x8x768xbf16> to vector<1x8x32xbf16>
    "tpu.trace_start"() <{level = 10 : i32, message = "bqd,bkd->bqk"}> : () -> ()
    %cst_20 = arith.constant dense<0.000000e+00> : vector<1x8x8xf32>
    %56 = tpu.matmul %53, %54, %cst_20 {dimension_numbers = #tpu.dot_dimension_numbers<[2], [2], [1], [1], [0, 0, 0, 1, 1, 1], [0], [0]>} : vector<1x8x32xbf16>, vector<1x8x32xbf16>, vector<1x8x8xf32> -> vector<1x8x8xf32>
    "tpu.trace_stop"() : () -> ()
    %cst_21 = arith.constant dense<0xFF800000> : vector<1x8xf32>
    %57 = vector.multi_reduction <maximumf>, %56, %cst_21 [2] : vector<1x8x8xf32> to vector<1x8xf32>
    %58 = vector.shape_cast %57 : vector<1x8xf32> to vector<1x8x1xf32>
    %59 = vector.broadcast %58 : vector<1x8x1xf32> to vector<1x8x8xf32>
    %60 = arith.subf %56, %59 : vector<1x8x8xf32>
    %61 = math.exp %60 : vector<1x8x8xf32>
    %cst_22 = arith.constant dense<0.000000e+00> : vector<1x8xf32>
    %62 = vector.multi_reduction <add>, %61, %cst_22 [2] : vector<1x8x8xf32> to vector<1x8xf32>
    %63 = vector.shape_cast %62 : vector<1x8xf32> to vector<1x8x1xf32>
    %64 = tpu.reciprocal %63 {approx = true} : vector<1x8x1xf32> -> vector<1x8x1xf32>
    %65 = vector.broadcast %64 : vector<1x8x1xf32> to vector<1x8x8xf32>
    %66 = arith.mulf %61, %65 : vector<1x8x8xf32>
    %67 = arith.truncf %66 : vector<1x8x8xf32> to vector<1x8x8xbf16>
    "tpu.trace_start"() <{level = 10 : i32, message = "bqk,bkd->bqd"}> : () -> ()
    %cst_23 = arith.constant dense<0.000000e+00> : vector<1x8x32xf32>
    %68 = tpu.matmul %67, %55, %cst_23 {dimension_numbers = #tpu.dot_dimension_numbers<[2], [1], [1], [2], [0, 0, 0, 1, 1, 2], [0], [0]>} : vector<1x8x8xbf16>, vector<1x8x32xbf16>, vector<1x8x32xf32> -> vector<1x8x32xf32>
    "tpu.trace_stop"() : () -> ()
    %69 = vector.shape_cast %68 : vector<1x8x32xf32> to vector<8x32xf32>
    %70 = arith.truncf %69 : vector<8x32xf32> to vector<8x32xbf16>
    %c64 = arith.constant 64 : index
    %c0_24 = arith.constant 0 : index
    %71 = vector.load %arg3[%c64, %c0_24] : memref<256x256xbf16, #tpu.memory_space<vmem>>, vector<32x256xbf16>
    %cst_25 = arith.constant dense<0.000000e+00> : vector<8x256xf32>
    %72 = tpu.matmul %70, %71, %cst_25 {dimension_numbers = #tpu.dot_dimension_numbers<[1], [0], [0], [1], [0, 0, 1, 1], [], []>} : vector<8x32xbf16>, vector<32x256xbf16>, vector<8x256xf32> -> vector<8x256xf32>
    %73 = arith.addf %52, %72 : vector<8x256xf32>
    %74 = vector.extract_strided_slice %9 {offsets = [0, 0, 96], sizes = [1, 8, 32], strides = [1, 1, 1]} : vector<1x8x768xbf16> to vector<1x8x32xbf16>
    %75 = vector.extract_strided_slice %9 {offsets = [0, 0, 352], sizes = [1, 8, 32], strides = [1, 1, 1]} : vector<1x8x768xbf16> to vector<1x8x32xbf16>
    %76 = vector.extract_strided_slice %9 {offsets = [0, 0, 608], sizes = [1, 8, 32], strides = [1, 1, 1]} : vector<1x8x768xbf16> to vector<1x8x32xbf16>
    "tpu.trace_start"() <{level = 10 : i32, message = "bqd,bkd->bqk"}> : () -> ()
    %cst_26 = arith.constant dense<0.000000e+00> : vector<1x8x8xf32>
    %77 = tpu.matmul %74, %75, %cst_26 {dimension_numbers = #tpu.dot_dimension_numbers<[2], [2], [1], [1], [0, 0, 0, 1, 1, 1], [0], [0]>} : vector<1x8x32xbf16>, vector<1x8x32xbf16>, vector<1x8x8xf32> -> vector<1x8x8xf32>
    "tpu.trace_stop"() : () -> ()
    %cst_27 = arith.constant dense<0xFF800000> : vector<1x8xf32>
    %78 = vector.multi_reduction <maximumf>, %77, %cst_27 [2] : vector<1x8x8xf32> to vector<1x8xf32>
    %79 = vector.shape_cast %78 : vector<1x8xf32> to vector<1x8x1xf32>
    %80 = vector.broadcast %79 : vector<1x8x1xf32> to vector<1x8x8xf32>
    %81 = arith.subf %77, %80 : vector<1x8x8xf32>
    %82 = math.exp %81 : vector<1x8x8xf32>
    %cst_28 = arith.constant dense<0.000000e+00> : vector<1x8xf32>
    %83 = vector.multi_reduction <add>, %82, %cst_28 [2] : vector<1x8x8xf32> to vector<1x8xf32>
    %84 = vector.shape_cast %83 : vector<1x8xf32> to vector<1x8x1xf32>
    %85 = tpu.reciprocal %84 {approx = true} : vector<1x8x1xf32> -> vector<1x8x1xf32>
    %86 = vector.broadcast %85 : vector<1x8x1xf32> to vector<1x8x8xf32>
    %87 = arith.mulf %82, %86 : vector<1x8x8xf32>
    %88 = arith.truncf %87 : vector<1x8x8xf32> to vector<1x8x8xbf16>
    "tpu.trace_start"() <{level = 10 : i32, message = "bqk,bkd->bqd"}> : () -> ()
    %cst_29 = arith.constant dense<0.000000e+00> : vector<1x8x32xf32>
    %89 = tpu.matmul %88, %76, %cst_29 {dimension_numbers = #tpu.dot_dimension_numbers<[2], [1], [1], [2], [0, 0, 0, 1, 1, 2], [0], [0]>} : vector<1x8x8xbf16>, vector<1x8x32xbf16>, vector<1x8x32xf32> -> vector<1x8x32xf32>
    "tpu.trace_stop"() : () -> ()
    %90 = vector.shape_cast %89 : vector<1x8x32xf32> to vector<8x32xf32>
    %91 = arith.truncf %90 : vector<8x32xf32> to vector<8x32xbf16>
    %c96 = arith.constant 96 : index
    %c0_30 = arith.constant 0 : index
    %92 = vector.load %arg3[%c96, %c0_30] : memref<256x256xbf16, #tpu.memory_space<vmem>>, vector<32x256xbf16>
    %cst_31 = arith.constant dense<0.000000e+00> : vector<8x256xf32>
    %93 = tpu.matmul %91, %92, %cst_31 {dimension_numbers = #tpu.dot_dimension_numbers<[1], [0], [0], [1], [0, 0, 1, 1], [], []>} : vector<8x32xbf16>, vector<32x256xbf16>, vector<8x256xf32> -> vector<8x256xf32>
    %94 = arith.addf %73, %93 : vector<8x256xf32>
    %95 = vector.extract_strided_slice %9 {offsets = [0, 0, 128], sizes = [1, 8, 32], strides = [1, 1, 1]} : vector<1x8x768xbf16> to vector<1x8x32xbf16>
    %96 = vector.extract_strided_slice %9 {offsets = [0, 0, 384], sizes = [1, 8, 32], strides = [1, 1, 1]} : vector<1x8x768xbf16> to vector<1x8x32xbf16>
    %97 = vector.extract_strided_slice %9 {offsets = [0, 0, 640], sizes = [1, 8, 32], strides = [1, 1, 1]} : vector<1x8x768xbf16> to vector<1x8x32xbf16>
    "tpu.trace_start"() <{level = 10 : i32, message = "bqd,bkd->bqk"}> : () -> ()
    %cst_32 = arith.constant dense<0.000000e+00> : vector<1x8x8xf32>
    %98 = tpu.matmul %95, %96, %cst_32 {dimension_numbers = #tpu.dot_dimension_numbers<[2], [2], [1], [1], [0, 0, 0, 1, 1, 1], [0], [0]>} : vector<1x8x32xbf16>, vector<1x8x32xbf16>, vector<1x8x8xf32> -> vector<1x8x8xf32>
    "tpu.trace_stop"() : () -> ()
    %cst_33 = arith.constant dense<0xFF800000> : vector<1x8xf32>
    %99 = vector.multi_reduction <maximumf>, %98, %cst_33 [2] : vector<1x8x8xf32> to vector<1x8xf32>
    %100 = vector.shape_cast %99 : vector<1x8xf32> to vector<1x8x1xf32>
    %101 = vector.broadcast %100 : vector<1x8x1xf32> to vector<1x8x8xf32>
    %102 = arith.subf %98, %101 : vector<1x8x8xf32>
    %103 = math.exp %102 : vector<1x8x8xf32>
    %cst_34 = arith.constant dense<0.000000e+00> : vector<1x8xf32>
    %104 = vector.multi_reduction <add>, %103, %cst_34 [2] : vector<1x8x8xf32> to vector<1x8xf32>
    %105 = vector.shape_cast %104 : vector<1x8xf32> to vector<1x8x1xf32>
    %106 = tpu.reciprocal %105 {approx = true} : vector<1x8x1xf32> -> vector<1x8x1xf32>
    %107 = vector.broadcast %106 : vector<1x8x1xf32> to vector<1x8x8xf32>
    %108 = arith.mulf %103, %107 : vector<1x8x8xf32>
    %109 = arith.truncf %108 : vector<1x8x8xf32> to vector<1x8x8xbf16>
    "tpu.trace_start"() <{level = 10 : i32, message = "bqk,bkd->bqd"}> : () -> ()
    %cst_35 = arith.constant dense<0.000000e+00> : vector<1x8x32xf32>
    %110 = tpu.matmul %109, %97, %cst_35 {dimension_numbers = #tpu.dot_dimension_numbers<[2], [1], [1], [2], [0, 0, 0, 1, 1, 2], [0], [0]>} : vector<1x8x8xbf16>, vector<1x8x32xbf16>, vector<1x8x32xf32> -> vector<1x8x32xf32>
    "tpu.trace_stop"() : () -> ()
    %111 = vector.shape_cast %110 : vector<1x8x32xf32> to vector<8x32xf32>
    %112 = arith.truncf %111 : vector<8x32xf32> to vector<8x32xbf16>
    %c128 = arith.constant 128 : index
    %c0_36 = arith.constant 0 : index
    %113 = vector.load %arg3[%c128, %c0_36] : memref<256x256xbf16, #tpu.memory_space<vmem>>, vector<32x256xbf16>
    %cst_37 = arith.constant dense<0.000000e+00> : vector<8x256xf32>
    %114 = tpu.matmul %112, %113, %cst_37 {dimension_numbers = #tpu.dot_dimension_numbers<[1], [0], [0], [1], [0, 0, 1, 1], [], []>} : vector<8x32xbf16>, vector<32x256xbf16>, vector<8x256xf32> -> vector<8x256xf32>
    %115 = arith.addf %94, %114 : vector<8x256xf32>
    %116 = vector.extract_strided_slice %9 {offsets = [0, 0, 160], sizes = [1, 8, 32], strides = [1, 1, 1]} : vector<1x8x768xbf16> to vector<1x8x32xbf16>
    %117 = vector.extract_strided_slice %9 {offsets = [0, 0, 416], sizes = [1, 8, 32], strides = [1, 1, 1]} : vector<1x8x768xbf16> to vector<1x8x32xbf16>
    %118 = vector.extract_strided_slice %9 {offsets = [0, 0, 672], sizes = [1, 8, 32], strides = [1, 1, 1]} : vector<1x8x768xbf16> to vector<1x8x32xbf16>
    "tpu.trace_start"() <{level = 10 : i32, message = "bqd,bkd->bqk"}> : () -> ()
    %cst_38 = arith.constant dense<0.000000e+00> : vector<1x8x8xf32>
    %119 = tpu.matmul %116, %117, %cst_38 {dimension_numbers = #tpu.dot_dimension_numbers<[2], [2], [1], [1], [0, 0, 0, 1, 1, 1], [0], [0]>} : vector<1x8x32xbf16>, vector<1x8x32xbf16>, vector<1x8x8xf32> -> vector<1x8x8xf32>
    "tpu.trace_stop"() : () -> ()
    %cst_39 = arith.constant dense<0xFF800000> : vector<1x8xf32>
    %120 = vector.multi_reduction <maximumf>, %119, %cst_39 [2] : vector<1x8x8xf32> to vector<1x8xf32>
    %121 = vector.shape_cast %120 : vector<1x8xf32> to vector<1x8x1xf32>
    %122 = vector.broadcast %121 : vector<1x8x1xf32> to vector<1x8x8xf32>
    %123 = arith.subf %119, %122 : vector<1x8x8xf32>
    %124 = math.exp %123 : vector<1x8x8xf32>
    %cst_40 = arith.constant dense<0.000000e+00> : vector<1x8xf32>
    %125 = vector.multi_reduction <add>, %124, %cst_40 [2] : vector<1x8x8xf32> to vector<1x8xf32>
    %126 = vector.shape_cast %125 : vector<1x8xf32> to vector<1x8x1xf32>
    %127 = tpu.reciprocal %126 {approx = true} : vector<1x8x1xf32> -> vector<1x8x1xf32>
    %128 = vector.broadcast %127 : vector<1x8x1xf32> to vector<1x8x8xf32>
    %129 = arith.mulf %124, %128 : vector<1x8x8xf32>
    %130 = arith.truncf %129 : vector<1x8x8xf32> to vector<1x8x8xbf16>
    "tpu.trace_start"() <{level = 10 : i32, message = "bqk,bkd->bqd"}> : () -> ()
    %cst_41 = arith.constant dense<0.000000e+00> : vector<1x8x32xf32>
    %131 = tpu.matmul %130, %118, %cst_41 {dimension_numbers = #tpu.dot_dimension_numbers<[2], [1], [1], [2], [0, 0, 0, 1, 1, 2], [0], [0]>} : vector<1x8x8xbf16>, vector<1x8x32xbf16>, vector<1x8x32xf32> -> vector<1x8x32xf32>
    "tpu.trace_stop"() : () -> ()
    %132 = vector.shape_cast %131 : vector<1x8x32xf32> to vector<8x32xf32>
    %133 = arith.truncf %132 : vector<8x32xf32> to vector<8x32xbf16>
    %c160 = arith.constant 160 : index
    %c0_42 = arith.constant 0 : index
    %134 = vector.load %arg3[%c160, %c0_42] : memref<256x256xbf16, #tpu.memory_space<vmem>>, vector<32x256xbf16>
    %cst_43 = arith.constant dense<0.000000e+00> : vector<8x256xf32>
    %135 = tpu.matmul %133, %134, %cst_43 {dimension_numbers = #tpu.dot_dimension_numbers<[1], [0], [0], [1], [0, 0, 1, 1], [], []>} : vector<8x32xbf16>, vector<32x256xbf16>, vector<8x256xf32> -> vector<8x256xf32>
    %136 = arith.addf %115, %135 : vector<8x256xf32>
    %137 = vector.extract_strided_slice %9 {offsets = [0, 0, 192], sizes = [1, 8, 32], strides = [1, 1, 1]} : vector<1x8x768xbf16> to vector<1x8x32xbf16>
    %138 = vector.extract_strided_slice %9 {offsets = [0, 0, 448], sizes = [1, 8, 32], strides = [1, 1, 1]} : vector<1x8x768xbf16> to vector<1x8x32xbf16>
    %139 = vector.extract_strided_slice %9 {offsets = [0, 0, 704], sizes = [1, 8, 32], strides = [1, 1, 1]} : vector<1x8x768xbf16> to vector<1x8x32xbf16>
    "tpu.trace_start"() <{level = 10 : i32, message = "bqd,bkd->bqk"}> : () -> ()
    %cst_44 = arith.constant dense<0.000000e+00> : vector<1x8x8xf32>
    %140 = tpu.matmul %137, %138, %cst_44 {dimension_numbers = #tpu.dot_dimension_numbers<[2], [2], [1], [1], [0, 0, 0, 1, 1, 1], [0], [0]>} : vector<1x8x32xbf16>, vector<1x8x32xbf16>, vector<1x8x8xf32> -> vector<1x8x8xf32>
    "tpu.trace_stop"() : () -> ()
    %cst_45 = arith.constant dense<0xFF800000> : vector<1x8xf32>
    %141 = vector.multi_reduction <maximumf>, %140, %cst_45 [2] : vector<1x8x8xf32> to vector<1x8xf32>
    %142 = vector.shape_cast %141 : vector<1x8xf32> to vector<1x8x1xf32>
    %143 = vector.broadcast %142 : vector<1x8x1xf32> to vector<1x8x8xf32>
    %144 = arith.subf %140, %143 : vector<1x8x8xf32>
    %145 = math.exp %144 : vector<1x8x8xf32>
    %cst_46 = arith.constant dense<0.000000e+00> : vector<1x8xf32>
    %146 = vector.multi_reduction <add>, %145, %cst_46 [2] : vector<1x8x8xf32> to vector<1x8xf32>
    %147 = vector.shape_cast %146 : vector<1x8xf32> to vector<1x8x1xf32>
    %148 = tpu.reciprocal %147 {approx = true} : vector<1x8x1xf32> -> vector<1x8x1xf32>
    %149 = vector.broadcast %148 : vector<1x8x1xf32> to vector<1x8x8xf32>
    %150 = arith.mulf %145, %149 : vector<1x8x8xf32>
    %151 = arith.truncf %150 : vector<1x8x8xf32> to vector<1x8x8xbf16>
    "tpu.trace_start"() <{level = 10 : i32, message = "bqk,bkd->bqd"}> : () -> ()
    %cst_47 = arith.constant dense<0.000000e+00> : vector<1x8x32xf32>
    %152 = tpu.matmul %151, %139, %cst_47 {dimension_numbers = #tpu.dot_dimension_numbers<[2], [1], [1], [2], [0, 0, 0, 1, 1, 2], [0], [0]>} : vector<1x8x8xbf16>, vector<1x8x32xbf16>, vector<1x8x32xf32> -> vector<1x8x32xf32>
    "tpu.trace_stop"() : () -> ()
    %153 = vector.shape_cast %152 : vector<1x8x32xf32> to vector<8x32xf32>
    %154 = arith.truncf %153 : vector<8x32xf32> to vector<8x32xbf16>
    %c192 = arith.constant 192 : index
    %c0_48 = arith.constant 0 : index
    %155 = vector.load %arg3[%c192, %c0_48] : memref<256x256xbf16, #tpu.memory_space<vmem>>, vector<32x256xbf16>
    %cst_49 = arith.constant dense<0.000000e+00> : vector<8x256xf32>
    %156 = tpu.matmul %154, %155, %cst_49 {dimension_numbers = #tpu.dot_dimension_numbers<[1], [0], [0], [1], [0, 0, 1, 1], [], []>} : vector<8x32xbf16>, vector<32x256xbf16>, vector<8x256xf32> -> vector<8x256xf32>
    %157 = arith.addf %136, %156 : vector<8x256xf32>
    %158 = vector.extract_strided_slice %9 {offsets = [0, 0, 224], sizes = [1, 8, 32], strides = [1, 1, 1]} : vector<1x8x768xbf16> to vector<1x8x32xbf16>
    %159 = vector.extract_strided_slice %9 {offsets = [0, 0, 480], sizes = [1, 8, 32], strides = [1, 1, 1]} : vector<1x8x768xbf16> to vector<1x8x32xbf16>
    %160 = vector.extract_strided_slice %9 {offsets = [0, 0, 736], sizes = [1, 8, 32], strides = [1, 1, 1]} : vector<1x8x768xbf16> to vector<1x8x32xbf16>
    "tpu.trace_start"() <{level = 10 : i32, message = "bqd,bkd->bqk"}> : () -> ()
    %cst_50 = arith.constant dense<0.000000e+00> : vector<1x8x8xf32>
    %161 = tpu.matmul %158, %159, %cst_50 {dimension_numbers = #tpu.dot_dimension_numbers<[2], [2], [1], [1], [0, 0, 0, 1, 1, 1], [0], [0]>} : vector<1x8x32xbf16>, vector<1x8x32xbf16>, vector<1x8x8xf32> -> vector<1x8x8xf32>
    "tpu.trace_stop"() : () -> ()
    %cst_51 = arith.constant dense<0xFF800000> : vector<1x8xf32>
    %162 = vector.multi_reduction <maximumf>, %161, %cst_51 [2] : vector<1x8x8xf32> to vector<1x8xf32>
    %163 = vector.shape_cast %162 : vector<1x8xf32> to vector<1x8x1xf32>
    %164 = vector.broadcast %163 : vector<1x8x1xf32> to vector<1x8x8xf32>
    %165 = arith.subf %161, %164 : vector<1x8x8xf32>
    %166 = math.exp %165 : vector<1x8x8xf32>
    %cst_52 = arith.constant dense<0.000000e+00> : vector<1x8xf32>
    %167 = vector.multi_reduction <add>, %166, %cst_52 [2] : vector<1x8x8xf32> to vector<1x8xf32>
    %168 = vector.shape_cast %167 : vector<1x8xf32> to vector<1x8x1xf32>
    %169 = tpu.reciprocal %168 {approx = true} : vector<1x8x1xf32> -> vector<1x8x1xf32>
    %170 = vector.broadcast %169 : vector<1x8x1xf32> to vector<1x8x8xf32>
    %171 = arith.mulf %166, %170 : vector<1x8x8xf32>
    %172 = arith.truncf %171 : vector<1x8x8xf32> to vector<1x8x8xbf16>
    "tpu.trace_start"() <{level = 10 : i32, message = "bqk,bkd->bqd"}> : () -> ()
    %cst_53 = arith.constant dense<0.000000e+00> : vector<1x8x32xf32>
    %173 = tpu.matmul %172, %160, %cst_53 {dimension_numbers = #tpu.dot_dimension_numbers<[2], [1], [1], [2], [0, 0, 0, 1, 1, 2], [0], [0]>} : vector<1x8x8xbf16>, vector<1x8x32xbf16>, vector<1x8x32xf32> -> vector<1x8x32xf32>
    "tpu.trace_stop"() : () -> ()
    %174 = vector.shape_cast %173 : vector<1x8x32xf32> to vector<8x32xf32>
    %175 = arith.truncf %174 : vector<8x32xf32> to vector<8x32xbf16>
    %c224 = arith.constant 224 : index
    %c0_54 = arith.constant 0 : index
    %176 = vector.load %arg3[%c224, %c0_54] : memref<256x256xbf16, #tpu.memory_space<vmem>>, vector<32x256xbf16>
    %cst_55 = arith.constant dense<0.000000e+00> : vector<8x256xf32>
    %177 = tpu.matmul %175, %176, %cst_55 {dimension_numbers = #tpu.dot_dimension_numbers<[1], [0], [0], [1], [0, 0, 1, 1], [], []>} : vector<8x32xbf16>, vector<32x256xbf16>, vector<8x256xf32> -> vector<8x256xf32>
    %178 = arith.addf %157, %177 : vector<8x256xf32>
    %c0_56 = arith.constant 0 : index
    %c0_57 = arith.constant 0 : index
    %179 = vector.load %arg5[%c0_56, %c0_57] : memref<1x256xf32, #tpu.memory_space<vmem>>, vector<1x256xf32>
    %180 = vector.broadcast %179 : vector<1x256xf32> to vector<8x256xf32>
    %181 = arith.addf %178, %180 : vector<8x256xf32>
    %182 = arith.addf %1, %181 : vector<8x256xf32>
    %cst_58 = arith.constant dense<0.000000e+00> : vector<8xf32>
    %183 = vector.multi_reduction <add>, %182, %cst_58 [1] : vector<8x256xf32> to vector<8xf32>
    %184 = vector.shape_cast %183 : vector<8xf32> to vector<8x1xf32>
    %cst_59 = arith.constant 2.560000e+02 : f32
    %185 = vector.broadcast %cst_59 : f32 to vector<8x1xf32>
    %186 = arith.divf %184, %185 : vector<8x1xf32>
    %187 = vector.broadcast %186 : vector<8x1xf32> to vector<8x256xf32>
    %188 = arith.subf %182, %187 : vector<8x256xf32>
    %189 = arith.mulf %188, %188 : vector<8x256xf32>
    %cst_60 = arith.constant dense<0.000000e+00> : vector<8xf32>
    %190 = vector.multi_reduction <add>, %189, %cst_60 [1] : vector<8x256xf32> to vector<8xf32>
    %191 = vector.shape_cast %190 : vector<8xf32> to vector<8x1xf32>
    %cst_61 = arith.constant 2.560000e+02 : f32
    %192 = vector.broadcast %cst_61 : f32 to vector<8x1xf32>
    %193 = arith.divf %191, %192 : vector<8x1xf32>
    %cst_62 = arith.constant 9.99999974E-6 : f32
    %194 = vector.broadcast %cst_62 : f32 to vector<8x1xf32>
    %195 = arith.addf %193, %194 : vector<8x1xf32>
    %196 = math.rsqrt %195 : vector<8x1xf32>
    %197 = vector.broadcast %196 : vector<8x1xf32> to vector<8x256xf32>
    %198 = arith.mulf %188, %197 : vector<8x256xf32>
    %c0_63 = arith.constant 0 : index
    %c0_64 = arith.constant 0 : index
    %199 = vector.load %arg6[%c0_63, %c0_64] : memref<1x256xf32, #tpu.memory_space<vmem>>, vector<1x256xf32>
    %200 = vector.broadcast %199 : vector<1x256xf32> to vector<8x256xf32>
    %201 = arith.mulf %198, %200 : vector<8x256xf32>
    %c0_65 = arith.constant 0 : index
    %c0_66 = arith.constant 0 : index
    %202 = vector.load %arg7[%c0_65, %c0_66] : memref<1x256xf32, #tpu.memory_space<vmem>>, vector<1x256xf32>
    %203 = vector.broadcast %202 : vector<1x256xf32> to vector<8x256xf32>
    %204 = arith.addf %201, %203 : vector<8x256xf32>
    %205 = arith.truncf %204 : vector<8x256xf32> to vector<8x256xbf16>
    %c0_67 = arith.constant 0 : index
    %c0_68 = arith.constant 0 : index
    %206 = vector.load %arg8[%c0_67, %c0_68] : memref<256x512xbf16, #tpu.memory_space<vmem>>, vector<256x512xbf16>
    %cst_69 = arith.constant dense<0.000000e+00> : vector<8x512xf32>
    %207 = tpu.matmul %205, %206, %cst_69 {dimension_numbers = #tpu.dot_dimension_numbers<[1], [0], [0], [1], [0, 0, 1, 1], [], []>} : vector<8x256xbf16>, vector<256x512xbf16>, vector<8x512xf32> -> vector<8x512xf32>
    %c0_70 = arith.constant 0 : index
    %c0_71 = arith.constant 0 : index
    %208 = vector.load %arg9[%c0_70, %c0_71] : memref<1x512xf32, #tpu.memory_space<vmem>>, vector<1x512xf32>
    %209 = vector.broadcast %208 : vector<1x512xf32> to vector<8x512xf32>
    %210 = arith.addf %207, %209 : vector<8x512xf32>
    %cst_72 = arith.constant 0.000000e+00 : f32
    %211 = vector.broadcast %cst_72 : f32 to vector<8x512xf32>
    %212 = arith.maximumf %210, %211 : vector<8x512xf32>
    %213 = arith.truncf %212 : vector<8x512xf32> to vector<8x512xbf16>
    %c0_73 = arith.constant 0 : index
    %c0_74 = arith.constant 0 : index
    %214 = vector.load %arg10[%c0_73, %c0_74] : memref<512x256xbf16, #tpu.memory_space<vmem>>, vector<512x256xbf16>
    %cst_75 = arith.constant dense<0.000000e+00> : vector<8x256xf32>
    %215 = tpu.matmul %213, %214, %cst_75 {dimension_numbers = #tpu.dot_dimension_numbers<[1], [0], [0], [1], [0, 0, 1, 1], [], []>} : vector<8x512xbf16>, vector<512x256xbf16>, vector<8x256xf32> -> vector<8x256xf32>
    %c0_76 = arith.constant 0 : index
    %c0_77 = arith.constant 0 : index
    %216 = vector.load %arg11[%c0_76, %c0_77] : memref<1x256xf32, #tpu.memory_space<vmem>>, vector<1x256xf32>
    %217 = vector.broadcast %216 : vector<1x256xf32> to vector<8x256xf32>
    %218 = arith.addf %215, %217 : vector<8x256xf32>
    %219 = arith.addf %204, %218 : vector<8x256xf32>
    %cst_78 = arith.constant dense<0.000000e+00> : vector<8xf32>
    %220 = vector.multi_reduction <add>, %219, %cst_78 [1] : vector<8x256xf32> to vector<8xf32>
    %221 = vector.shape_cast %220 : vector<8xf32> to vector<8x1xf32>
    %cst_79 = arith.constant 2.560000e+02 : f32
    %222 = vector.broadcast %cst_79 : f32 to vector<8x1xf32>
    %223 = arith.divf %221, %222 : vector<8x1xf32>
    %224 = vector.broadcast %223 : vector<8x1xf32> to vector<8x256xf32>
    %225 = arith.subf %219, %224 : vector<8x256xf32>
    %226 = arith.mulf %225, %225 : vector<8x256xf32>
    %cst_80 = arith.constant dense<0.000000e+00> : vector<8xf32>
    %227 = vector.multi_reduction <add>, %226, %cst_80 [1] : vector<8x256xf32> to vector<8xf32>
    %228 = vector.shape_cast %227 : vector<8xf32> to vector<8x1xf32>
    %cst_81 = arith.constant 2.560000e+02 : f32
    %229 = vector.broadcast %cst_81 : f32 to vector<8x1xf32>
    %230 = arith.divf %228, %229 : vector<8x1xf32>
    %cst_82 = arith.constant 9.99999974E-6 : f32
    %231 = vector.broadcast %cst_82 : f32 to vector<8x1xf32>
    %232 = arith.addf %230, %231 : vector<8x1xf32>
    %233 = math.rsqrt %232 : vector<8x1xf32>
    %234 = vector.broadcast %233 : vector<8x1xf32> to vector<8x256xf32>
    %235 = arith.mulf %225, %234 : vector<8x256xf32>
    %c0_83 = arith.constant 0 : index
    %c0_84 = arith.constant 0 : index
    %236 = vector.load %arg12[%c0_83, %c0_84] : memref<1x256xf32, #tpu.memory_space<vmem>>, vector<1x256xf32>
    %237 = vector.broadcast %236 : vector<1x256xf32> to vector<8x256xf32>
    %238 = arith.mulf %235, %237 : vector<8x256xf32>
    %c0_85 = arith.constant 0 : index
    %c0_86 = arith.constant 0 : index
    %239 = vector.load %arg13[%c0_85, %c0_86] : memref<1x256xf32, #tpu.memory_space<vmem>>, vector<1x256xf32>
    %240 = vector.broadcast %239 : vector<1x256xf32> to vector<8x256xf32>
    %241 = arith.addf %238, %240 : vector<8x256xf32>
    %242 = vector.shape_cast %241 : vector<8x256xf32> to vector<1x8x256xf32>
    %c0_87 = arith.constant 0 : index
    %c0_88 = arith.constant 0 : index
    %c0_89 = arith.constant 0 : index
    %243 = vector.load %arg14[%c0_87, %c0_88, %c0_89] : memref<1x8x256xf32, #tpu.memory_space<vmem>>, vector<1x8x256xf32>
    tpu.vector_store %arg14[%c0_87, %c0_88, %c0_89], %242 {strides = array<i32>} : memref<1x8x256xf32, #tpu.memory_space<vmem>>, vector<1x8x256xf32>,
    return
  }
  func.func @transform_0(%arg0: i32) -> (i32, i32, i32) {
    %c0_i32 = arith.constant 0 : i32
    %c0_i32_0 = arith.constant 0 : i32
    %c0_i32_1 = arith.constant 0 : i32
    return %arg0, %c0_i32, %c0_i32_0 : i32, i32, i32
  }
  func.func @transform_1(%arg0: i32) -> (i32, i32) {
    %c0_i32 = arith.constant 0 : i32
    %c0_i32_0 = arith.constant 0 : i32
    %c0_i32_1 = arith.constant 0 : i32
    return %c0_i32, %c0_i32_0 : i32, i32
  }
  func.func @transform_2(%arg0: i32) -> (i32, i32) {
    %c0_i32 = arith.constant 0 : i32
    %c0_i32_0 = arith.constant 0 : i32
    %c0_i32_1 = arith.constant 0 : i32
    return %c0_i32, %c0_i32_0 : i32, i32
  }
  func.func @transform_3(%arg0: i32) -> (i32, i32) {
    %c0_i32 = arith.constant 0 : i32
    %c0_i32_0 = arith.constant 0 : i32
    %c0_i32_1 = arith.constant 0 : i32
    return %c0_i32, %c0_i32_0 : i32, i32
  }
  func.func @transform_4(%arg0: i32) -> (i32, i32) {
    %c0_i32 = arith.constant 0 : i32
    %c0_i32_0 = arith.constant 0 : i32
    %c0_i32_1 = arith.constant 0 : i32
    return %c0_i32, %c0_i32_0 : i32, i32
  }
  func.func @transform_5(%arg0: i32) -> (i32, i32) {
    %c0_i32 = arith.constant 0 : i32
    %c0_i32_0 = arith.constant 0 : i32
    %c0_i32_1 = arith.constant 0 : i32
    return %c0_i32, %c0_i32_0 : i32, i32
  }
  func.func @transform_6(%arg0: i32) -> (i32, i32) {
    %c0_i32 = arith.constant 0 : i32
    %c0_i32_0 = arith.constant 0 : i32
    %c0_i32_1 = arith.constant 0 : i32
    return %c0_i32, %c0_i32_0 : i32, i32
  }
  func.func @transform_7(%arg0: i32) -> (i32, i32) {
    %c0_i32 = arith.constant 0 : i32
    %c0_i32_0 = arith.constant 0 : i32
    %c0_i32_1 = arith.constant 0 : i32
    return %c0_i32, %c0_i32_0 : i32, i32
  }
  func.func @transform_8(%arg0: i32) -> (i32, i32) {
    %c0_i32 = arith.constant 0 : i32
    %c0_i32_0 = arith.constant 0 : i32
    %c0_i32_1 = arith.constant 0 : i32
    return %c0_i32, %c0_i32_0 : i32, i32
  }
  func.func @transform_9(%arg0: i32) -> (i32, i32) {
    %c0_i32 = arith.constant 0 : i32
    %c0_i32_0 = arith.constant 0 : i32
    %c0_i32_1 = arith.constant 0 : i32
    return %c0_i32, %c0_i32_0 : i32, i32
  }
  func.func @transform_10(%arg0: i32) -> (i32, i32) {
    %c0_i32 = arith.constant 0 : i32
    %c0_i32_0 = arith.constant 0 : i32
    %c0_i32_1 = arith.constant 0 : i32
    return %c0_i32, %c0_i32_0 : i32, i32
  }
  func.func @transform_11(%arg0: i32) -> (i32, i32) {
    %c0_i32 = arith.constant 0 : i32
    %c0_i32_0 = arith.constant 0 : i32
    %c0_i32_1 = arith.constant 0 : i32
    return %c0_i32, %c0_i32_0 : i32, i32
  }
  func.func @transform_12(%arg0: i32) -> (i32, i32) {
    %c0_i32 = arith.constant 0 : i32
    %c0_i32_0 = arith.constant 0 : i32
    %c0_i32_1 = arith.constant 0 : i32
    return %c0_i32, %c0_i32_0 : i32, i32
  }
  func.func @transform_13(%arg0: i32) -> (i32, i32, i32) {
    %c0_i32 = arith.constant 0 : i32
    %c0_i32_0 = arith.constant 0 : i32
    %c0_i32_1 = arith.constant 0 : i32
    return %arg0, %c0_i32, %c0_i32_0 : i32, i32, i32
  }
}

</mosaic_0001>

<bundles_post_ra>
// kernel: tpu_custom_call.1
= control target key start
LH: loop header
LB: loop body
LE: loop exit
PB: predicated region body
PF: predicated region fallthrough
CT: control target
= control target key end

     0   :  { %s5739_s0 = inlined_call_operand.hbm [shape: f32[2,8,256], index: 0, kind: input, shape index: {}]   ;;  %s5740_s1 = inlined_call_operand.hbm [shape: bf16[256,768], index: 1, kind: input, shape index: {}]   ;;  %s5741_s2 = inlined_call_operand.hbm [shape: bf16[256,256], index: 2, kind: input, shape index: {}]   ;;  %s5742_s3 = inlined_call_operand.vmem [shape: f32[1,768], index: 3, kind: input, shape index: {}]   ;;  %s5743_s4 = inlined_call_operand.vmem [shape: f32[1,256], index: 4, kind: input, shape index: {}]   ;;  %s5744_s5 = inlined_call_operand.vmem [shape: f32[1,256], index: 5, kind: input, shape index: {}]   ;;  %s5745_s6 = inlined_call_operand.vmem [shape: f32[1,256], index: 6, kind: input, shape index: {}]   ;;  %s5746_s7 = inlined_call_operand.hbm [shape: bf16[256,512], index: 7, kind: input, shape index: {}]   ;;  %s5747_s8 = inlined_call_operand.vmem [shape: f32[1,512], index: 8, kind: input, shape index: {}]   ;;  %s5748_s9 = inlined_call_operand.hbm [shape: bf16[512,256], index: 9, kind: input, shape index: {}]   ;;  %s5749_s10 = inlined_call_operand.vmem [shape: f32[1,256], index: 10, kind: input, shape index: {}]   ;;  %s5750_s11 = inlined_call_operand.vmem [shape: f32[1,256], index: 11, kind: input, shape index: {}]   ;;  %s5751_s12 = inlined_call_operand.vmem [shape: f32[1,256], index: 12, kind: input, shape index: {}]   ;;  %s5752_s13 = inlined_call_operand.hbm [shape: f32[2,8,256], index: 13, kind: output, shape index: {}]  }
   0x1   :  { %5757 = sst [smem:[#allocation16_spill]] %s5740_s1 }
   0x2   :  { %5758 = sst [smem:[#allocation17_spill]] %s5747_s8 }
   0x3   :  { %5759 = sst [smem:[#allocation18_spill]] %s5749_s10 }
   0x4   :  { %5760 = sst [smem:[#allocation19_spill]] %s5750_s11 }
   0x5   :  { %5761 = sst [smem:[#allocation20_spill]] %s5751_s12 }
   0x6   :  { %5762 = sst [smem:[#allocation21_spill]] %s5752_s13 }
   0x7   :  { %18 = vsyncpa [#allocation3], 0 }
   0x8   :  { %20 = vsyncpa [#allocation3 + $0x1], 0 }
   0x9   :  { %21 = vsyncpa [#allocation6], 0 }
   0xa   :  { %22 = vsyncpa [#allocation9], 0 }
   0xb   :  { %23 = vsyncpa [#allocation4], 0 }
   0xc   :  { %25 = vsyncpa [#allocation4 + $0x1], 0  ;;  %s5165_s25 = smov 0   ;;  %s5167_s26 = smov 0  }
   0xd   :  { %s5169_s27 = smov 0   ;;  %s5171_s28 = smov 0  }
   0xe LB: > { %s5077_s29 = smov [#allocation5]   ;;  %s5186_s14 = sadd.s32 4294967295, %s5075_s28   ;;  %s5075_s28 = sphi %s5171_s28, %s5789_s28   ;;  %s5071_s27 = sphi %s5169_s27, %s5788_s27   ;;  %s5067_s26 = sphi %s5167_s26, %s5787_s26   ;;  %s5063_s25 = sphi %s5165_s25, %s5786_s25  }
   0xf   : > { %s352_s30 = sshll.u32 %s5077_s29, 4  ;;  %p3907_p0 = scmp.ge.s32.totalorder %s5075_s28, 1  ;;  %s5191_s30 = int_to_ptr.vmem [resolvable:$true] %s352_s30 }
  0x10   : > { %p5754_p1 = scmp.eq.s32.totalorder %s5186_s14, 0  ;;  %p340_p2 = scmp.lt.s32.totalorder %s5075_s28, 3 }
  0x11   : > { %s5078_s16 = smov [#allocation8]   ;;  %s5079_s19 = smov [#allocation7]  }
  0x12   : > { %p5193_p3 = pnand %p3907_p0, %p340_p2  ;;  %s390_s17 = sshll.u32 %s5078_s16, 4  ;;  %s5206_s17 = int_to_ptr.vmem [resolvable:$true] %s390_s17 }
  0x13   : > { %s5208_s20 = sshll.u32 %s5079_s19, 4  ;;  %s5765_s1 = sld [smem:[#allocation16_spill]]  ;;  %s366_s20 = int_to_ptr.vmem [resolvable:$true] %s5208_s20 }
  0x14   : > { %s5763_s15 = scalar_select %p5193_p3, 1, 0 }
  0x15   : > { %p4358_p5 = pneg %p5193_p3 }
  0x17   : > { %p5202_p6 = pnand %p4358_p5, %p5754_p1 }
  0x19   : > { %s4859_s23 = scalar_lea.hbm %s5765_s1, 12288  ;;  %p5218_p8 = pneg %p5202_p6 }
  0x1a   : > { %p4860_p7 = scmp.ne.s32.totalorder %s5765_s1, %s4859_s23  ;;  %p4866_p11 = scmp.lt.u32.totalorder %s4859_s23, %s5765_s1 }
  0x1c   : > { %p4862_p9 = pnand %p5218_p8, %p4860_p7 }
  0x1e   : > { %p4863_p10 = pneg %p4862_p9 }
  0x20   : > { %p4868_p12 = pnand %p4866_p11, %p4863_p10 }
  0x22   : > { %4871 = shalt.err (!%p4868_p12)
}
  0x23   : > { %s4872_s21 = scalar_lea.vmem %s5191_s30, 12288  ;;  %p4880_p5 = scmp.lt.s32.totalorder %s5191_s30, %s5191_s30 }
  0x24   : > { %p4873_p13 = scmp.ne.s32.totalorder %s5191_s30, %s4872_s21  ;;  %p4881_p4 = scmp.lt.s32.totalorder %s4872_s21, %s4872_s21 }
  0x26   : > { %p4875_p0 = pnand %p4873_p13, %p5218_p8  ;;  %p4882_p7 = por %p4881_p4, %p4880_p5 }
  0x28   : > { %p4876_p2 = pneg %p4875_p0 }
  0x2a   : > { %p4883_p9 = pnand %p4882_p7, %p4876_p2 }
  0x2c   : > { %4886 = shalt.err (!%p4883_p9)
}
  0x2d   : > { %s5080_s22 = smov 384   ;;  %s5081_s13 = smov 24  }
  0x2e   : > { %4361 = dma.hbm_to_vmem [thread:$0]  (!%p5202_p6), %s5765_s1, 12288, %s5191_s30, [#allocation6], %s5080_s22, %s5080_s22, %s5081_s13  }
  0x2f   : > { %s4887_s12 = scalar_lea.hbm %s5746_s7, 8192 }
  0x30   : > { %p4888_p4 = scmp.ne.s32.totalorder %s5746_s7, %s4887_s12  ;;  %p4894_p12 = scmp.lt.u32.totalorder %s4887_s12, %s5746_s7 }
  0x32   : > { %p4890_p10 = pnand %p4888_p4, %p5218_p8 }
  0x34   : > { %p4891_p11 = pneg %p4890_p10 }
  0x36   : > { %p4896_p13 = pnand %p4894_p12, %p4891_p11 }
  0x38   : > { %4899 = shalt.err (!%p4896_p13)
}
  0x39   : > { %s4900_s30 = scalar_lea.vmem %s5206_s17, 8192  ;;  %p4908_p7 = scmp.lt.s32.totalorder %s5206_s17, %s5206_s17 }
  0x3a   : > { %p4901_p0 = scmp.ne.s32.totalorder %s5206_s17, %s4900_s30  ;;  %p4909_p9 = scmp.lt.s32.totalorder %s4900_s30, %s4900_s30 }
  0x3c   : > { %p4903_p2 = pnand %p4901_p0, %p5218_p8  ;;  %p4910_p4 = por %p4909_p9, %p4908_p7 }
  0x3e   : > { %p4904_p5 = pneg %p4903_p2 }
  0x40   : > { %p4911_p10 = pnand %p4910_p4, %p4904_p5 }
  0x42   : > { %4914 = shalt.err (!%p4911_p10)
}
  0x43   : > { %s5082_s10 = smov 256   ;;  %s5083_s8 = smov 16  }
  0x44   : > { %4367 = dma.hbm_to_vmem [thread:$0]  (!%p5202_p6), %s5746_s7, 8192, %s5206_s17, [#allocation9], %s5082_s10, %s5082_s10, %s5083_s8  }
  0x45   : > { %s4915_s23 = scalar_lea.hbm %s5741_s2, 4096 }
  0x46   : > { %p4916_p11 = scmp.ne.s32.totalorder %s5741_s2, %s4915_s23  ;;  %p4922_p0 = scmp.lt.u32.totalorder %s4915_s23, %s5741_s2 }
  0x48   : > { %p4918_p12 = pnand %p4916_p11, %p5218_p8 }
  0x4a   : > { %p4919_p13 = pneg %p4918_p12 }
  0x4c   : > { %p4924_p2 = pnand %p4922_p0, %p4919_p13 }
  0x4e   : > { %4927 = shalt.err (!%p4924_p2)
}
  0x4f   : > { %s4928_s30 = scalar_lea.vmem %s366_s20, 4096  ;;  %p4936_p4 = scmp.lt.s32.totalorder %s366_s20, %s366_s20 }
  0x50   : > { %p4929_p5 = scmp.ne.s32.totalorder %s366_s20, %s4928_s30  ;;  %p4937_p10 = scmp.lt.s32.totalorder %s4928_s30, %s4928_s30 }
  0x52   : > { %p4931_p7 = pnand %p4929_p5, %p5218_p8  ;;  %p4938_p1 = por %p4937_p10, %p4936_p4 }
  0x54   : > { %p4932_p9 = pneg %p4931_p7 }
  0x56   : > { %p4939_p3 = pnand %p4938_p1, %p4932_p9 }
  0x58   : > { %4942 = shalt.err (!%p4939_p3)
}
  0x59   : > { %s5084_s17 = smov 128   ;;  %s5085_s10 = smov 8  }
  0x5a   : > { %4364 = dma.hbm_to_vmem [thread:$0]  (!%p5202_p6), %s5741_s2, 4096, %s366_s20, [#allocation6], %s5084_s17, %s5084_s17, %s5085_s10  }
  0x5b   : > { %s5086_s12 = smov [#allocation10]   ;;  %s4943_s24 = scalar_lea.hbm %s5748_s9, 8192 }
  0x5c   : > { %s406_s22 = sshll.u32 %s5086_s12, 4  ;;  %p4944_p1 = scmp.ne.s32.totalorder %s5748_s9, %s4943_s24  ;;  %s407_s22 = int_to_ptr.vmem [resolvable:$true] %s406_s22 }
  0x5d   : > { %p4950_p12 = scmp.lt.u32.totalorder %s4943_s24, %s5748_s9 }
  0x5e   : > { %p4946_p3 = pnand %p4944_p1, %p5218_p8 }
  0x60   : > { %p4947_p11 = pneg %p4946_p3 }
  0x62   : > { %p4952_p13 = pnand %p4950_p12, %p4947_p11 }
  0x64   : > { %4955 = shalt.err (!%p4952_p13)
}
  0x65   : > { %s4956_s20 = scalar_lea.vmem %s407_s22, 8192  ;;  %p4964_p7 = scmp.lt.s32.totalorder %s407_s22, %s407_s22 }
  0x66   : > { %p4957_p0 = scmp.ne.s32.totalorder %s407_s22, %s4956_s20  ;;  %p4965_p9 = scmp.lt.s32.totalorder %s4956_s20, %s4956_s20 }
  0x68   : > { %p4959_p2 = pnand %p4957_p0, %p5218_p8  ;;  %p4966_p4 = por %p4965_p9, %p4964_p7 }
  0x6a   : > { %p4960_p5 = pneg %p4959_p2 }
  0x6c   : > { %p4967_p10 = pnand %p4966_p4, %p4960_p5 }
  0x6e   : > { %4970 = shalt.err (!%p4967_p10)
}
  0x6f   : > { %4370 = dma.hbm_to_vmem [thread:$0]  (!%p5202_p6), %s5748_s9, 8192, %s407_s22, [#allocation9], %s5084_s17, %s5084_s17, %s5085_s10  }
  0x70   : > { %s3906_s16 = sadd.s32 4294967294, %s5075_s28   ;;  %s5301_s18 = sadd.s32 1, %s5075_s28  }
  0x71   : > { %s35_s12 = ssub.s32 %s5075_s28, %s5301_s18  ;;  %s38_s13 = sadd.s32 1, %s5071_s27 }
  0x72   : > { %p36_p8 = scmp.eq.s32.totalorder %s35_s12, 0  ;;  %p45_p1 = scmp.ne.s32.totalorder %s5071_s27, %s5067_s26 }
  0x73   : > { %p46_p3 = scmp.eq.s32.totalorder %s5075_s28, 0  ;;  %p51_p11 = scmp.ne.s32.totalorder %s5067_s26, %s5063_s25 }
  0x74   : > { %s5312_s23 = scalar_select %p36_p8, %s5071_s27, %s38_s13  }
  0x75   : > { %p5314_p12 = por %p46_p3, %p45_p1  ;;  %p5768_p13 = scmp.eq.s32.totalorder %s5186_s14, 0 }
  0x76   : > { %p327_p0 = scmp.eq.s32.totalorder %s5186_s14, 1  ;;  %p333_p2 = scmp.eq.s32.totalorder %s3906_s16, 1 }
  0x77   : > { %p5320_p6 = por %p5768_p13, %p51_p11  ;;  %p4383_p5 = scmp.lt.s32.totalorder %s5075_s28, 2 }
  0x78   : > { %s429_s10 = sand.u32 1, %s5071_s27   ;;  %p5327_p7 = por %p327_p0, %p45_p1 }
  0x79   : > { %p5331_p9 = por %p333_p2, %p51_p11  ;;  %s3913_s19 = sshll.u32 %s429_s10, 4 }
  0x7a   : > { %s5770_s22 = scalar_select %p5327_p7, 1, 0 }
  0x7b   : > { %s5771_s29 = scalar_select %p5331_p9, 1, 0 }
  0x7c   : > { %s4208_s21 = sshll.u32 %s5075_s28, 8  ;;  %s433_s11 = scalar_lea.vmem [#allocation2], %s3913_s19 }
  0x7d   : > { %s5339_s8 = scalar_lea.hbm %s5739_s0, %s4208_s21  ;;  %s441_s16 = sshll.u32 %s433_s11, 4  ;;  %s5341_s16 = int_to_ptr.vmem [resolvable:$true] %s441_s16 }
  0x7e   : > { %p5345_p4 = pnand %p4383_p5, %p5314_p12  ;;  %s430_s13 = scalar_lea.sflag [#allocation3], %s429_s10 }
  0x7f   : > { %s4971_s1 = scalar_lea.hbm %s5339_s8, 256  ;;  %s4976_s30 = scalar_lea.hbm %s5739_s0, 512 }
  0x80   : > { %p4972_p10 = scmp.ne.s32.totalorder %s5339_s8, %s4971_s1  ;;  %p4973_p8 = pneg %p5345_p4 }
  0x81   : > { %p4977_p11 = scmp.lt.u32.totalorder %s5339_s8, %s5739_s0  ;;  %p4978_p12 = scmp.lt.u32.totalorder %s4976_s30, %s4971_s1 }
  0x82   : > { %p4974_p1 = pnand %p4973_p8, %p4972_p10  ;;  %p4980_p0 = scmp.lt.u32.totalorder %s4971_s1, %s5339_s8 }
  0x83   : > { %p4979_p13 = por %p4978_p12, %p4977_p11 }
  0x84   : > { %p4975_p3 = pneg %p4974_p1 }
  0x85   : > { %p4981_p2 = por %p4980_p0, %p4979_p13 }
  0x87   : > { %p4982_p5 = pnand %p4981_p2, %p4975_p3 }
  0x89   : > { %4985 = shalt.err (!%p4982_p5)
}
  0x8a   : > { %s4986_s10 = scalar_lea.vmem %s5341_s16, 256  ;;  %s5087_s11 = smov [#allocation2]  }
  0x8b   : > { %p4987_p10 = scmp.ne.s32.totalorder %s5341_s16, %s4986_s10  ;;  %s4991_s19 = sshll.u32 %s5087_s11, 4  ;;  %s4992_s19 = int_to_ptr.vmem [resolvable:$false] %s4991_s19 }
  0x8c   : > { %s4993_s21 = scalar_lea.vmem %s4992_s19, 512  ;;  %p4994_p7 = scmp.lt.s32.totalorder %s5341_s16, %s4992_s19 }
  0x8d   : > { %p4989_p1 = pnand %p4987_p10, %p4973_p8  ;;  %p4995_p11 = scmp.lt.s32.totalorder %s4993_s21, %s4986_s10 }
  0x8f   : > { %p4990_p9 = pneg %p4989_p1  ;;  %p4996_p12 = por %p4995_p11, %p4994_p7 }
  0x91   : > { %p4997_p13 = pnand %p4996_p12, %p4990_p9 }
  0x93   : > { %5000 = shalt.err (!%p4997_p13)
}
  0x94   : > { %4374 = dma.hbm_to_vmem [thread:$0]  (!%p5345_p4), %s5339_s8, 256, %s5341_s16, %s430_s13  }
  0x95   : > { %p5773_p3 = scmp.ne.s32.totalorder %s5763_s15, 0 }
  0x96   : > { %s5377_s1 = sand.u32 (!%p5773_p3), 1, %s5067_s26  }
  0x97   : > { %450 = sbr.rel (%p5773_p3) target bundleno = 6480 (0x1950), region = 72  ;;  %s3917_s30 = sshll.u32 (!%p5773_p3), %s5377_s1, 4 }
  0x98   : > { %s453_s24 = scalar_lea.sflag (!%p5773_p3), [#allocation3], %s5377_s1  ;;  %s5383_s20 = scalar_lea.vmem (!%p5773_p3), [#allocation2], %s3917_s30 }
  0x9e   : > { %5046 = dma.done.wait (%p5320_p6), %s453_s24, 256  }
  0x9f   : > { %5048 = vsyncadd (%p5320_p6), %s453_s24, 4294967040  ;;  %p5774_p7 = scmp.eq.s32.totalorder %s5186_s14, 0 }
  0xa1   : > { %5050 = dma.done.wait (%p5774_p7), [#allocation6], 16384   ;;  %p5775_p9 = pmov %p5774_p7 }
  0xa2   : > { %p5776_p4 = pmov %p5774_p7 }
  0xa3   : > { %5052 = vsyncadd (%p5775_p9), [#allocation6], 4294950912 }
  0xa4   : > { %5054 = dma.done.wait (%p5776_p4), [#allocation9], 16384   ;;  %p5777_p8 = pmov %p5776_p4 }
  0xa5   : > { %v4437_v0 = vld [vmem:[#allocation5 + $0xc] ss:$24 sps:$4 sm:$0xff]   ;;  %v4439_v1 = vld [vmem:[#allocation5 + $0x8] ss:$24 sps:$4 sm:$0xff]   ;;  %v4440_v2 = vld [vmem:[#allocation5 + $0x3c] ss:$24 sps:$4 sm:$0xff]  }
  0xa6   : > { %5056 = vsyncadd (%p5777_p8), [#allocation9], 4294950912  ;;  %1169 = vmatprep.subr.bf16.mxu1 %v4437_v0  ;;  %v4442_v3 = vld [vmem:[#allocation5 + $0x4] ss:$24 sps:$4 sm:$0xff]   ;;  %v4444_v4 = vld [vmem:[#allocation5 + $0x38] ss:$24 sps:$4 sm:$0xff]  }
  0xa7   : > { %1170 = vmatpush1.bf16.msra.mxu1 %v4439_v1  ;;  %v4445_v5 = vld [vmem:[#allocation5] ss:$24 sps:$4 sm:$0xff]   ;;  %v4446_v6 = vld [vmem:[#allocation5 + $0x6c] ss:$24 sps:$4 sm:$0xff]   ;;  %1128 = vmatprep.subr.bf16.mxu0 %v4442_v3  ;;  %v4451_v8 = vld [vmem:[#allocation5 + $0x30] ss:$24 sps:$4 sm:$0xff]  }
  0xa8   : > { %1171 = vmatprep.subr.bf16.mxu1 %v4440_v2  ;;  %v4448_v7 = vld [vmem:[#allocation5 + $0x34] ss:$24 sps:$4 sm:$0xff]   ;;  %1129 = vmatpush1.bf16.msra.mxu0 %v4445_v5  ;;  %v4450_v9 = vld [vmem:[#allocation5 + $0x68] ss:$24 sps:$4 sm:$0xff]   ;;  %v4454_v11 = vld [vmem:[#allocation5 + $0x64] ss:$24 sps:$4 sm:$0xff]   ;;  %v618_v5 = vlaneseq }
  0xa9   : > { %1130 = vmatprep.subr.bf16.mxu0 %v4448_v7  ;;  %v4452_v10 = vld [vmem:[#allocation5 + $0x9c] ss:$24 sps:$4 sm:$0xff]   ;;  %v4457_v12 = vld [vmem:[#allocation5 + $0x60] ss:$24 sps:$4 sm:$0xff]   ;;  %v4458_v15 = vld [vmem:[#allocation5 + $0xcc] ss:$24 sps:$4 sm:$0xff]  }
  0xaa   : > { %v4456_v13 = vld [vmem:[#allocation5 + $0x98] ss:$24 sps:$4 sm:$0xff]   ;;  %v4460_v14 = vld [vmem:[#allocation5 + $0x94] ss:$24 sps:$4 sm:$0xff]   ;;  %v4462_v16 = vld [vmem:[#allocation5 + $0xc8] ss:$24 sps:$4 sm:$0xff]  }
  0xab   : > { %1172 = vmatpush1.bf16.msra.mxu1 %v4444_v4  ;;  %v4463_v17 = vld [vmem:[#allocation5 + $0x90] ss:$24 sps:$4 sm:$0xff]   ;;  %v4466_v18 = vld [vmem:[#allocation5 + $0xc4] ss:$24 sps:$4 sm:$0xff]   ;;  %v4469_v20 = vld [vmem:[#allocation5 + $0xc0] ss:$24 sps:$4 sm:$0xff]  }
  0xac   : > { %1173 = vmatprep.subr.bf16.mxu1 %v4446_v6  ;;  %1131 = vmatpush1.bf16.msra.mxu0 %v4451_v8  ;;  %v4464_v19 = vld [vmem:[#allocation5 + $0xfc] ss:$24 sps:$4 sm:$0xff]   ;;  %v4468_v21 = vld [vmem:[#allocation5 + $0xf8] ss:$24 sps:$4 sm:$0xff]   ;;  %v4470_v23 = vld [vmem:[#allocation5 + $0x12c] ss:$24 sps:$4 sm:$0xff]  }
  0xad   : > { %1132 = vmatprep.subr.bf16.mxu0 %v4454_v11  ;;  %v4472_v22 = vld [vmem:[#allocation5 + $0xf4] ss:$24 sps:$4 sm:$0xff]   ;;  %v4474_v24 = vld [vmem:[#allocation5 + $0x128] ss:$24 sps:$4 sm:$0xff]   ;;  %v4478_v26 = vld [vmem:[#allocation5 + $0x124] ss:$24 sps:$4 sm:$0xff]  }
  0xae   : > { %v4475_v25 = vld [vmem:[#allocation5 + $0xf0] ss:$24 sps:$4 sm:$0xff]   ;;  %v4476_v27 = vld [vmem:[#allocation5 + $0x15c] ss:$24 sps:$4 sm:$0xff]   ;;  %v4481_v28 = vld [vmem:[#allocation5 + $0x120] ss:$24 sps:$4 sm:$0xff]  }
  0xaf   : > { %1174 = vmatpush1.bf16.msra.mxu1 %v4450_v9  ;;  %v4480_v29 = vld [vmem:[#allocation5 + $0x158] ss:$24 sps:$4 sm:$0xff]   ;;  %v4484_v30 = vld [vmem:[#allocation5 + $0x154] ss:$24 sps:$4 sm:$0xff]   ;;  %v4486_v32 = vld [vmem:[#allocation5 + $0x188] ss:$24 sps:$4 sm:$0xff]  }
  0xb0   : > { %1175 = vmatprep.subr.bf16.mxu1 %v4452_v10  ;;  %1133 = vmatpush1.bf16.msra.mxu0 %v4457_v12  ;;  %v4482_v31 = vld [vmem:[#allocation5 + $0x18c] ss:$24 sps:$4 sm:$0xff]   ;;  %v4487_v33 = vld [vmem:[#allocation5 + $0x150] ss:$24 sps:$4 sm:$0xff]   ;;  %v4488_v35 = vld [vmem:[#allocation5 + $0x1bc] ss:$24 sps:$4 sm:$0xff]  }
  0xb1   : > { %1134 = vmatprep.subr.bf16.mxu0 %v4460_v14  ;;  %v4490_v34 = vld [vmem:[#allocation5 + $0x184] ss:$24 sps:$4 sm:$0xff]   ;;  %v4493_v36 = vld [vmem:[#allocation5 + $0x180] ss:$24 sps:$4 sm:$0xff]   ;;  %v4496_v38 = vld [vmem:[#allocation5 + $0x1b4] ss:$24 sps:$4 sm:$0xff]  }
  0xb2   : > { %v4492_v37 = vld [vmem:[#allocation5 + $0x1b8] ss:$24 sps:$4 sm:$0xff]   ;;  %v4494_v39 = vld [vmem:[#allocation5 + $0x1ec] ss:$24 sps:$4 sm:$0xff]   ;;  %v4498_v40 = vld [vmem:[#allocation5 + $0x1e8] ss:$24 sps:$4 sm:$0xff]  }
  0xb3   : > { %1176 = vmatpush1.bf16.msra.mxu1 %v4456_v13  ;;  %v4499_v41 = vld [vmem:[#allocation5 + $0x1b0] ss:$24 sps:$4 sm:$0xff]   ;;  %v4502_v42 = vld [vmem:[#allocation5 + $0x1e4] ss:$24 sps:$4 sm:$0xff]   ;;  %v4505_v46 = vld [vmem:[#allocation5 + $0x1e0] ss:$24 sps:$4 sm:$0xff]  }
  0xb4   : > { %1177 = vmatprep.subr.bf16.mxu1 %v4458_v15  ;;  %1135 = vmatpush1.bf16.msra.mxu0 %v4463_v17  ;;  %v4500_v43 = vld [vmem:[#allocation5 + $0x21c] ss:$24 sps:$4 sm:$0xff]   ;;  %v4504_v44 = vld [vmem:[#allocation5 + $0x218] ss:$24 sps:$4 sm:$0xff]   ;;  %v4506_v48 = vld [vmem:[#allocation5 + $0x24c] ss:$24 sps:$4 sm:$0xff]  }
  0xb5   : > { %1136 = vmatprep.subr.bf16.mxu0 %v4466_v18  ;;  %v517_v45 = vld [vmem:[%s5383_s20 + $0x8] sm:$0xff]  ;;  %v516_v0 = vld [vmem:[%s5383_s20] sm:$0xff]  ;;  %v5088_v4 = vmov 0.0   ;;  %vm5089_vm0 = vmmov 0   ;;  %v5406_v6 = vshrl.u32 %v618_v5, 7  ;;  %vm1257_vm1 = vcmask 261120  }
  0xb6   : > { %v519_v47 = vpack.c.bf16 %v517_v45, %v517_v45  ;;  %v4508_v49 = vld [vmem:[#allocation5 + $0x214] ss:$24 sps:$4 sm:$0xff]   ;;  %v4511_v50 = vld [vmem:[#allocation5 + $0x210] ss:$24 sps:$4 sm:$0xff]   ;;  %v4514_v52 = vld [vmem:[#allocation5 + $0x244] ss:$24 sps:$4 sm:$0xff]   ;;  %v5399_v3 = vpack.c.bf16 %v516_v0, %v516_v0 }
  0xb7   : > { %1178 = vmatpush1.bf16.msra.mxu1 %v4462_v16  ;;  %v4510_v51 = vld [vmem:[#allocation5 + $0x248] ss:$24 sps:$4 sm:$0xff]   ;;  %v4512_v53 = vld [vmem:[#allocation5 + $0x27c] ss:$24 sps:$4 sm:$0xff]   ;;  %v4516_v55 = vld [vmem:[#allocation5 + $0x278] ss:$24 sps:$4 sm:$0xff]  }
  0xb8   : > { %1179 = vmatprep.subr.bf16.mxu1 %v4464_v19  ;;  %1137 = vmatpush1.bf16.msra.mxu0 %v4469_v20  ;;  %v4517_v54 = vld [vmem:[#allocation5 + $0x240] ss:$24 sps:$4 sm:$0xff]   ;;  %v4520_v56 = vld [vmem:[#allocation5 + $0x274] ss:$24 sps:$4 sm:$0xff]   ;;  %v4523_v58 = vld [vmem:[#allocation5 + $0x270] ss:$24 sps:$4 sm:$0xff]  }
  0xb9   : > { %1138 = vmatprep.subr.bf16.mxu0 %v4472_v22  ;;  %1201 = vmatprep.mubr.bf16.mxu1 %v519_v47  ;;  %v4518_v57 = vld [vmem:[#allocation5 + $0x2ac] ss:$24 sps:$4 sm:$0xff]   ;;  %v4522_v59 = vld [vmem:[#allocation5 + $0x2a8] ss:$24 sps:$4 sm:$0xff]   ;;  %v4524_v61 = vld [vmem:[#allocation5 + $0x2dc] ss:$24 sps:$4 sm:$0xff]  }
  0xba   : > { %1160 = vmatprep.mubr.bf16.mxu0 %v519_v47  ;;  %v4526_v60 = vld [vmem:[#allocation5 + $0x2a4] ss:$24 sps:$4 sm:$0xff]   ;;  %v4529_v62 = vld [vmem:[#allocation5 + $0x2a0] ss:$24 sps:$4 sm:$0xff]   ;;  %v4530_v1 = vld [vmem:[#allocation5 + $0x2d4] ss:$24 sps:$4 sm:$0xff]  }
  0xbb   : > { %1180 = vmatpush1.bf16.msra.mxu1 %v4468_v21  ;;  %v4528_v63 = vld [vmem:[#allocation5 + $0x2d8] ss:$24 sps:$4 sm:$0xff]   ;;  %v628_v7 = vsub.s32 2, %v5406_v6  ;;  %v5412_v8 = vld [vmem:[%s5742_s3] sm:$0x3f]  ;;  %v5415_v9 = vsub.s32 0, %v5406_v6 }
  0xbc   : > { %1181 = vmatprep.subr.bf16.mxu1 %v4470_v23  ;;  %1139 = vmatpush1.bf16.msra.mxu0 %v4475_v25  ;;  %v4532_v2 = vld [vmem:[#allocation5 + $0x2d0] ss:$24 sps:$4 sm:$0xff]   ;;  %s5090_s8 = smov 96   ;;  %v4565_v45 = vld [vmem:[#allocation5 + $0x1f4] ss:$24 sps:$4 sm:$0xff]   ;;  %vm1304_vm2 = vcmask 64512  }
  0xbd   : > { %1140 = vmatprep.subr.bf16.mxu0 %v4478_v26  ;;  %v629_v10 = vrot.slane %v5412_v8, %v628_v7  ;;  %v621_v12 = vrot.slane %v5412_v8, %v5415_v9  ;;  %v4533_v25 = vld [vmem:[#allocation5 + $0x10] ss:$24 sps:$4 sm:$0xff]   ;;  %v4535_v26 = vld [vmem:[#allocation5 + $0x14] ss:$24 sps:$4 sm:$0xff]   ;;  %vm1320_vm3 = vcmask 1043456   ;;  %s5091_s16 = smov 64  }
  0xbe   : > { %s5093_s12 = smov 32   ;;  %s5778_s17 = sld [smem:[#allocation17_spill]] }
  0xbf   : > { %1182 = vmatpush1.bf16.msra.mxu1 %v4474_v24  ;;  %s5780_s11 = sld [smem:[#allocation19_spill]]  ;;  %s5781_s24 = sld [smem:[#allocation20_spill]] }
  0xc0   : > { %1183 = vmatprep.subr.bf16.mxu1 %v4476_v27  ;;  %1141 = vmatpush1.bf16.msra.mxu0 %v4481_v28  ;;  %v4538_v27 = vld [vmem:[#allocation5 + $0x44] ss:$24 sps:$4 sm:$0xff]   ;;  %v4536_v28 = vld [vmem:[#allocation5 + $0x40] ss:$24 sps:$4 sm:$0xff]   ;;  %s514_s15 = scalar_lea.vmem [#allocation11], %s3917_s30  ;;  %p5783_p0 = scmp.ne.s32.totalorder %s5770_s22, 0 }
  0xc1   : > { %1142 = vmatprep.subr.bf16.mxu0 %v4484_v30  ;;  %v4539_v30 = vld [vmem:[#allocation5 + $0x70] ss:$24 sps:$4 sm:$0xff]   ;;  %s5094_s30 = smov [#allocation11]  }
  0xc3   : > { %1184 = vmatpush1.bf16.msra.mxu1 %v4480_v29  ;;  %v4541_v29 = vld [vmem:[#allocation5 + $0x74] ss:$24 sps:$4 sm:$0xff]  }
  0xc4   : > { %1185 = vmatprep.subr.bf16.mxu1 %v4482_v31  ;;  %1143 = vmatpush1.bf16.msra.mxu0 %v4487_v33  ;;  %v4544_v31 = vld [vmem:[#allocation5 + $0xa4] ss:$24 sps:$4 sm:$0xff]   ;;  %v4547_v33 = vld [vmem:[#allocation5 + $0xd4] ss:$24 sps:$4 sm:$0xff]  }
  0xc5   : > { %1144 = vmatprep.subr.bf16.mxu0 %v4490_v34  ;;  %v4545_v34 = vld [vmem:[#allocation5 + $0xd0] ss:$24 sps:$4 sm:$0xff]  }
  0xc7   : > { %1186 = vmatpush1.bf16.msra.mxu1 %v4486_v32  ;;  %v4542_v32 = vld [vmem:[#allocation5 + $0xa0] ss:$24 sps:$4 sm:$0xff]  }
  0xc8   : > { %1187 = vmatprep.subr.bf16.mxu1 %v4488_v35  ;;  %1145 = vmatpush1.bf16.msra.mxu0 %v4493_v36  ;;  %v4550_v35 = vld [vmem:[#allocation5 + $0x104] ss:$24 sps:$4 sm:$0xff]   ;;  %v4548_v36 = vld [vmem:[#allocation5 + $0x100] ss:$24 sps:$4 sm:$0xff]  }
  0xc9   : > { %1146 = vmatprep.subr.bf16.mxu0 %v4496_v38  ;;  %v4551_v38 = vld [vmem:[#allocation5 + $0x130] ss:$24 sps:$4 sm:$0xff]  }
  0xcb   : > { %1188 = vmatpush1.bf16.msra.mxu1 %v4492_v37  ;;  %v4553_v37 = vld [vmem:[#allocation5 + $0x134] ss:$24 sps:$4 sm:$0xff]  }
  0xcc   : > { %1189 = vmatprep.subr.bf16.mxu1 %v4494_v39  ;;  %1147 = vmatpush1.bf16.msra.mxu0 %v4499_v41  ;;  %v4556_v39 = vld [vmem:[#allocation5 + $0x164] ss:$24 sps:$4 sm:$0xff]   ;;  %v4559_v41 = vld [vmem:[#allocation5 + $0x194] ss:$24 sps:$4 sm:$0xff]  }
  0xcd   : > { %1148 = vmatprep.subr.bf16.mxu0 %v4502_v42  ;;  %v4557_v42 = vld [vmem:[#allocation5 + $0x190] ss:$24 sps:$4 sm:$0xff]  }
  0xcf   : > { %1190 = vmatpush1.bf16.msra.mxu1 %v4498_v40  ;;  %v4554_v40 = vld [vmem:[#allocation5 + $0x160] ss:$24 sps:$4 sm:$0xff]  }
  0xd0   : > { %1191 = vmatprep.subr.bf16.mxu1 %v4500_v43  ;;  %1149 = vmatpush1.bf16.msra.mxu0 %v4505_v46  ;;  %v4562_v43 = vld [vmem:[#allocation5 + $0x1c4] ss:$24 sps:$4 sm:$0xff]   ;;  %v4563_v46 = vld [vmem:[#allocation5 + $0x1f0] ss:$24 sps:$4 sm:$0xff]  }
  0xd1   : > { %1150 = vmatprep.subr.bf16.mxu0 %v4508_v49  ;;  %v4571_v49 = vld [vmem:[#allocation5 + $0x254] ss:$24 sps:$4 sm:$0xff]  }
  0xd3   : > { %1192 = vmatpush1.bf16.msra.mxu1 %v4504_v44  ;;  %v4560_v44 = vld [vmem:[#allocation5 + $0x1c0] ss:$24 sps:$4 sm:$0xff]  }
  0xd4   : > { %1193 = vmatprep.subr.bf16.mxu1 %v4506_v48  ;;  %1151 = vmatpush1.bf16.msra.mxu0 %v4511_v50  ;;  %v4566_v48 = vld [vmem:[#allocation5 + $0x220] ss:$24 sps:$4 sm:$0xff]   ;;  %v4569_v50 = vld [vmem:[#allocation5 + $0x250] ss:$24 sps:$4 sm:$0xff]  }
  0xd5   : > { %1152 = vmatprep.subr.bf16.mxu0 %v4514_v52  ;;  %v4572_v52 = vld [vmem:[#allocation5 + $0x280] ss:$24 sps:$4 sm:$0xff]  }
  0xd7   : > { %1194 = vmatpush1.bf16.msra.mxu1 %v4510_v51  ;;  %v4574_v51 = vld [vmem:[#allocation5 + $0x284] ss:$24 sps:$4 sm:$0xff]  }
  0xd8   : > { %1195 = vmatprep.subr.bf16.mxu1 %v4512_v53  ;;  %1153 = vmatpush1.bf16.msra.mxu0 %v4517_v54  ;;  %v4577_v53 = vld [vmem:[#allocation5 + $0x2b4] ss:$24 sps:$4 sm:$0xff]   ;;  %v4575_v54 = vld [vmem:[#allocation5 + $0x2b0] ss:$24 sps:$4 sm:$0xff]  }
  0xd9   : > { %1154 = vmatprep.subr.bf16.mxu0 %v4520_v56  ;;  %v4578_v56 = vld [vmem:[#allocation5 + $0x2e0] ss:$24 sps:$4 sm:$0xff]  }
  0xdb   : > { %1196 = vmatpush1.bf16.msra.mxu1 %v4516_v55  ;;  %v4580_v55 = vld [vmem:[#allocation5 + $0x2e4] ss:$24 sps:$4 sm:$0xff]  }
  0xdc   : > { %1197 = vmatprep.subr.bf16.mxu1 %v4518_v57  ;;  %1155 = vmatpush1.bf16.msra.mxu0 %v4523_v58 }
  0xdd   : > { %1156 = vmatprep.subr.bf16.mxu0 %v4526_v60 }
  0xdf   : > { %1198 = vmatpush1.bf16.msra.mxu1 %v4522_v59 }
  0xe0   : > { %1199 = vmatprep.subr.bf16.mxu1 %v4524_v61  ;;  %1157 = vmatpush1.bf16.msra.mxu0 %v4529_v62 }
  0xe1   : > { %1158 = vmatprep.subr.bf16.mxu0 %v4530_v1 }
  0xe3   : > { %1200 = vmatpush1.bf16.msra.mxu1 %v4528_v63 }
  0xe4   : > { %1159 = vmatpush1.bf16.msra.mxu0 %v4532_v2  ;;  %4242 = vmatprep.subr.bf16.mxu1 %v5088_v4 }
  0xe5   : > { %1210 = vmatprep.subr.bf16.mxu0 %v4535_v26 }
  0xe6   : > { %1202 = vmatmul.mubr.bf16.vlgmr.msra.gmra.mrb[0].mxu1 %v5399_v3 }
  0xe7   : > { %1161 = vmatmul.mubr.bf16.vlgmr.msra.gmra.mrb[0].mxu0 %v5399_v3  ;;  %4244 = vmatprep.mubr.msk.bf16.mxu1 %vm5089_vm0, %v5088_v4 }
  0xe8   : > { %1242 = vmatprep.mubr.bf16.mxu0 %v519_v47  ;;  %1211 = vmatpush1.bf16.msra.mxu0 %v4533_v25  ;;  %v4568_v47 = vld [vmem:[#allocation5 + $0x224] ss:$24 sps:$4 sm:$0xff]  }
  0xe9   : > { %1212 = vmatprep.subr.bf16.mxu0 %v4538_v27 }
  0xec   : > { %1213 = vmatpush1.bf16.msra.mxu0 %v4536_v28 }
  0xed   : > { %1214 = vmatprep.subr.bf16.mxu0 %v4541_v29 }
  0xf0   : > { %1215 = vmatpush1.bf16.msra.mxu0 %v4539_v30 }
  0xf1   : > { %1216 = vmatprep.subr.bf16.mxu0 %v4544_v31 }
  0xf4   : > { %1217 = vmatpush1.bf16.msra.mxu0 %v4542_v32 }
  0xf5   : > { %1218 = vmatprep.subr.bf16.mxu0 %v4547_v33 }
  0xf8   : > { %1219 = vmatpush1.bf16.msra.mxu0 %v4545_v34 }
  0xf9   : > { %1220 = vmatprep.subr.bf16.mxu0 %v4550_v35 }
  0xfc   : > { %1221 = vmatpush1.bf16.msra.mxu0 %v4548_v36 }
  0xfd   : > { %1222 = vmatprep.subr.bf16.mxu0 %v4553_v37 }
 0x100   : > { %1223 = vmatpush1.bf16.msra.mxu0 %v4551_v38 }
 0x101   : > { %1224 = vmatprep.subr.bf16.mxu0 %v4556_v39 }
 0x104   : > { %1225 = vmatpush1.bf16.msra.mxu0 %v4554_v40 }
 0x105   : > { %1226 = vmatprep.subr.bf16.mxu0 %v4559_v41 }
 0x108   : > { %1227 = vmatpush1.bf16.msra.mxu0 %v4557_v42 }
 0x109   : > { %1228 = vmatprep.subr.bf16.mxu0 %v4562_v43 }
 0x10c   : > { %1229 = vmatpush1.bf16.msra.mxu0 %v4560_v44  ;;  %v4583_v44 = vld [vmem:[#allocation7 + $0x24] ss:$8 sps:$4 sm:$0xff]  }
 0x10d   : > { %1230 = vmatprep.subr.bf16.mxu0 %v4565_v45 }
 0x110   : > { %1231 = vmatpush1.bf16.msra.mxu0 %v4563_v46 }
 0x111   : > { %1232 = vmatprep.subr.bf16.mxu0 %v4568_v47 }
 0x114   : > { %1233 = vmatpush1.bf16.msra.mxu0 %v4566_v48  ;;  %v4581_v48 = vld [vmem:[#allocation7 + $0x20] ss:$8 sps:$4 sm:$0xff]  }
 0x115   : > { %1234 = vmatprep.subr.bf16.mxu0 %v4571_v49 }
 0x118   : > { %1235 = vmatpush1.bf16.msra.mxu0 %v4569_v50  ;;  %v4586_v50 = vld [vmem:[#allocation7 + $0x34] ss:$8 sps:$4 sm:$0xff]  }
 0x119   : > { %1236 = vmatprep.subr.bf16.mxu0 %v4574_v51  ;;  %v4584_v51 = vld [vmem:[#allocation7 + $0x30] ss:$8 sps:$4 sm:$0xff]  }
 0x11c   : > { %1237 = vmatpush1.bf16.msra.mxu0 %v4572_v52  ;;  %v4589_v52 = vld [vmem:[#allocation7 + $0x4] ss:$8 sps:$4 sm:$0xff]  }
 0x11d   : > { %1238 = vmatprep.subr.bf16.mxu0 %v4577_v53  ;;  %v5092_v53 = vmov 0  }
 0x120   : > { %1239 = vmatpush1.bf16.msra.mxu0 %v4575_v54 }
 0x121   : > { %1240 = vmatprep.subr.bf16.mxu0 %v4580_v55  ;;  %v4587_v55 = vld [vmem:[#allocation7] ss:$8 sps:$4 sm:$0xff]  }
 0x124   : > { %1241 = vmatpush1.bf16.msra.mxu0 %v4578_v56 }
 0x127   : > { %1243 = vmatmul.mubr.bf16.vlgmr.msra.gmra.mrb[4].mxu0 %v5399_v3 }
 0x128   : > { %1785 = vmatprep.mubr.bf16.mxu0 %v5092_v53 }
 0x1b9   : > { %v1203_v11 = vpop.f32.mrb[0].mxu1 }
 0x1ba   : > { %v1204_v13 = vadd.f32 %v1203_v11, %v629_v10  ;;  %v5422_v14 = vpop.f32.mrb[1].mxu1  ;;  %v1162_v18 = vpop.f32.mrb[0].mxu0 }
 0x1bb   : > { %v1207_v15 = vpop.f32.mrb[2].mxu1  ;;  %v1163_v19 = vadd.f32 %v1162_v18, %v621_v12  ;;  %v5426_v20 = vpop.f32.mrb[1].mxu0  ;;  %v636_v12 = vsub.s32 4, %v5406_v6 }
 0x1bc   : > { %v5424_v16 = vpack.c.bf16 %v1204_v13, %v1204_v13  ;;  %v1208_v17 = vpop.f32.mrb[3].mxu1  ;;  %v1166_v22 = vpop.f32.mrb[2].mxu0 }
 0x1bd   : > { %v5432_v23 = vpack.c.bf16 %v1163_v19, %v1163_v19  ;;  %v1167_v24 = vpop.f32.mrb[3].mxu0  ;;  %v637_v13 = vrot.slane %v5412_v8, %v636_v12 }
 0x1be   : > { %1373 = vrot.lane.b32.xlu1 %v5424_v16, %s5090_s8  ;;  %v1262_v21 = vsel %vm1257_vm1, %v5424_v16, 0 }
 0x1bf   : > { %4243 = vmatpush3.bf16.xpose.msra.mxu1 %v1262_v21 }
 0x1c0   : > { %4248 = vmatprep.subr.bf16.mxu1 %v5088_v4 }
 0x1c2   : > { %1370 = vrot.lane.b32.xlu1 %v5432_v23, %s5090_s8 }
 0x1c6   : > { %4245 = vmatmul.mubr.msk.bf16.vlgmr.msra.gmra.mrb[4].mxu1 %vm1257_vm1, %v5432_v23 }
 0x1c7   : > { %4250 = vmatprep.mubr.msk.bf16.mxu1 %vm5089_vm0, %v5088_v4 }
 0x1fa   : > { %v1244_v1 = vpop.f32.mrb[4].mxu0 }
 0x1fb   : > { %v5443_v2 = vpop.f32.mrb[5].mxu0  ;;  %v1245_v15 = vadd.f32 %v1244_v1, %v637_v13 }
 0x1fc   : > { %v1248_v5 = vpop.f32.mrb[6].mxu0 }
 0x1fd   : > { %v1249_v10 = vpop.f32.mrb[7].mxu0  ;;  %v5448_v17 = vpack.c.bf16 %v1245_v15, %v1245_v15 }
 0x1ff   : > { %v1322_v18 = vsel %vm1320_vm3, %v5448_v17, 0 }
 0x200   : > { %4249 = vmatpush3.bf16.msra.mxu1 %v1322_v18 }
 0x201   : > { %4254 = vmatprep.subr.bf16.mxu1 %v5088_v4 }
 0x230   : > { %v1374_v24 = vpop.permute.xlu1 %1373 }
 0x231   : > { %v1379_v26 = vsel %vm1257_vm1, %v1374_v24, 0 }
 0x234   : > { %v1371_v27 = vpop.permute.xlu1 %1370 }
 0x299   : > { %v1298_v57 = vpop.f32.mrb[4].mxu1 }
 0x29a   : > { %v4246_v58 = vpop.f32.mrb[5].mxu1  ;;  %v1305_v59 = vsel %vm1304_vm2, %v1298_v57, -inf }
 0x29b   : > { %1306 = vmax.xlane.f32.xlu0 %v1305_v59  ;;  %v1301_v60 = vpop.f32.mrb[6].mxu1  ;;  %v4592_v58 = vld [vmem:[#allocation7 + $0x14] ss:$8 sps:$4 sm:$0xff]  }
 0x29c   : > { %v4247_v61 = vpop.f32.mrb[7].mxu1 }
 0x29d   : > { %v4590_v61 = vld [vmem:[#allocation7 + $0x10] ss:$8 sps:$4 sm:$0xff]  }
 0x328   : > { %v1307_v62 = vpop.xlane.xlu0 %1306 }
 0x329   : > { %v1308_v63 = vsub.f32 %v1298_v57, %v1307_v62 }
 0x32b   : > { %v1309_v0 = vmul.f32 1.442695, %v1308_v63 }
 0x32d   : > { %4821 = vpow2.f32 %v1309_v0 }
 0x337   : > { %v4822_v11 = vpop.eup %4821 }
 0x338   : > { %v1311_v3 = vsel %vm1304_vm2, %v4822_v11, 0.0 }
 0x339   : > { %1312 = vadd.xlane.f32.xlu0 %v1311_v3 }
 0x3c6   : > { %v1313_v19 = vpop.xlane.xlu0 %1312 }
 0x3c7   : > { %4823 = vrcp.f32 %v1313_v19 }
 0x3d1   : > { %v4824_v21 = vpop.eup %4823 }
 0x3d2   : > { %v1315_v22 = vmul.f32 %v4824_v21, %v4822_v11 }
 0x3d4   : > { %v1316_v25 = vpack.c.bf16 %v1315_v22, %v1315_v22 }
 0x3d6   : > { %4251 = vmatmul.mubr.msk.bf16.vlgmr.msra.gmra.mrb[8].mxu1 %vm1304_vm2, %v1316_v25 }
 0x3d7   : > { %4255 = vmatpush3.bf16.xpose.msra.mxu1 %v1379_v26  ;;  %4256 = vmatprep.mubr.msk.bf16.mxu1 %vm5089_vm0, %v5088_v4 }
 0x3d8   : > { %4260 = vmatprep.subr.bf16.mxu1 %v5088_v4 }
 0x3de   : > { %4257 = vmatmul.mubr.msk.bf16.vlgmr.msra.gmra.mrb[12].mxu1 %vm1257_vm1, %v1371_v27 }
 0x3df   : > { %4262 = vmatprep.mubr.msk.bf16.mxu1 %vm5089_vm0, %v5088_v4 }
 0x4a9   : > { %v1358_v28 = vpop.f32.mrb[8].mxu1 }
 0x4aa   : > { %v4252_v29 = vpop.f32.mrb[9].mxu1  ;;  %v1364_v62 = vpack.c.bf16 %v1358_v28, %v1358_v28 }
 0x4ab   : > { %v1361_v30 = vpop.f32.mrb[10].mxu1 }
 0x4ac   : > { %v4253_v31 = vpop.f32.mrb[11].mxu1 }
 0x4b1   : > { %v1415_v32 = vpop.f32.mrb[12].mxu1 }
 0x4b2   : > { %v4258_v33 = vpop.f32.mrb[13].mxu1  ;;  %v1421_v34 = vsel %vm1304_vm2, %v1415_v32, -inf }
 0x4b3   : > { %1422 = vmax.xlane.f32.xlu0 %v1421_v34  ;;  %v1418_v35 = vpop.f32.mrb[14].mxu1 }
 0x4b4   : > { %v4259_v36 = vpop.f32.mrb[15].mxu1  ;;  %v4593_v35 = vld [vmem:[#allocation7 + $0x40] ss:$8 sps:$4 sm:$0xff]  }
 0x4b5   : > { %v4595_v36 = vld [vmem:[#allocation7 + $0x44] ss:$8 sps:$4 sm:$0xff]  }
 0x4b6   : > { %1753 = vmatprep.subr.bf16.mxu0 %v4595_v36 }
 0x4b7   : > { %1754 = vmatpush1.bf16.msra.mxu0 %v4593_v35 }
 0x4c9   : > { %1434 = vrot.lane.b32.xlu0 %v5448_v17, %s5090_s8 }
 0x4cd   : > { %1617 = vrot.lane.b32.xlu0 %v5424_v16, %s5091_s16 }
 0x4d1   : > { %1615 = vrot.lane.b32.xlu0 %v5432_v23, %s5091_s16 }
 0x540   : > { %v1423_v37 = vpop.xlane.xlu0 %1422 }
 0x541   : > { %v1424_v38 = vsub.f32 %v1415_v32, %v1423_v37  ;;  %v4598_v37 = vld [vmem:[#allocation7 + $0x54] ss:$8 sps:$4 sm:$0xff]  }
 0x542   : > { %1755 = vmatprep.subr.bf16.mxu0 %v4598_v37 }
 0x543   : > { %v1425_v39 = vmul.f32 1.442695, %v1424_v38  ;;  %v4596_v38 = vld [vmem:[#allocation7 + $0x50] ss:$8 sps:$4 sm:$0xff]  }
 0x544   : > { %v1435_v40 = vpop.permute.xlu0 %1434  ;;  %1756 = vmatpush1.bf16.msra.mxu0 %v4596_v38 }
 0x545   : > { %4825 = vpow2.f32 %v1425_v39  ;;  %v1440_v41 = vsel %vm1320_vm3, %v1435_v40, 0  ;;  %4284 = vmatprep.subr.bf16.mxu0 %v5088_v4 }
 0x546   : > { %4261 = vmatpush3.bf16.msra.mxu1 %v1440_v41 }
 0x547   : > { %1510 = vmatprep.subr.bf16.mxu1 %v4583_v44 }
 0x548   : > { %v1618_v63 = vpop.permute.xlu0 %1617 }
 0x549   : > { %v1623_v0 = vsel %vm1257_vm1, %v1618_v63, 0  ;;  %v4601_v63 = vld [vmem:[#allocation7 + $0x64] ss:$8 sps:$4 sm:$0xff]  }
 0x54c   : > { %v1616_v5 = vpop.permute.xlu0 %1615 }
 0x54f   : > { %v4826_v42 = vpop.eup %4825 }
 0x550   : > { %v1427_v43 = vsel %vm1304_vm2, %v4826_v42, 0.0 }
 0x551   : > { %1428 = vadd.xlane.f32.xlu1 %v1427_v43 }
 0x562   : > { %1677 = vrot.lane.b32.xlu1 %v5448_v17, %s5091_s16 }
 0x5de   : > { %v1429_v45 = vpop.xlane.xlu1 %1428 }
 0x5df   : > { %4827 = vrcp.f32 %v1429_v45 }
 0x5e2   : > { %v1678_v1 = vpop.permute.xlu1 %1677 }
 0x5e3   : > { %v1683_v10 = vsel %vm1320_vm3, %v1678_v1, 0 }
 0x5e9   : > { %v4828_v46 = vpop.eup %4827 }
 0x5ea   : > { %v1431_v47 = vmul.f32 %v4828_v46, %v4826_v42 }
 0x5ec   : > { %v1432_v49 = vpack.c.bf16 %v1431_v47, %v1431_v47 }
 0x5ee   : > { %4263 = vmatmul.mubr.msk.bf16.vlgmr.msra.gmra.mrb[16].mxu1 %vm1304_vm2, %v1432_v49 }
 0x5ef   : > { %1511 = vmatpush1.bf16.msra.mxu1 %v4581_v48  ;;  %1542 = vmatprep.mubr.bf16.mxu1 %v5092_v53 }
 0x5f0   : > { %1512 = vmatprep.subr.bf16.mxu1 %v4586_v50 }
 0x5f3   : > { %1513 = vmatpush1.bf16.msra.mxu1 %v4584_v51 }
 0x5f4   : > { %1574 = vmatprep.subr.bf16.mxu1 %v4589_v52 }
 0x6c1   : > { %v1476_v54 = vpop.f32.mrb[16].mxu1 }
 0x6c2   : > { %v1482_v56 = vpack.c.bf16 %v1476_v54, %v1476_v54  ;;  %v4264_v57 = vpop.f32.mrb[17].mxu1 }
 0x6c3   : > { %v1479_v59 = vpop.f32.mrb[18].mxu1 }
 0x6c4   : > { %v4265_v60 = vpop.f32.mrb[19].mxu1  ;;  %4027 = vmatmul.mubr.msk.bf16.vlgmr.msra.gmra.mrb[20].mxu1 %vm1257_vm1, %v1482_v56 }
 0x6c5   : > { %1575 = vmatpush1.bf16.msra.mxu1 %v4587_v55  ;;  %1606 = vmatprep.mubr.bf16.mxu1 %v5092_v53 }
 0x6c6   : > { %1576 = vmatprep.subr.bf16.mxu1 %v4592_v58 }
 0x6c9   : > { %1577 = vmatpush1.bf16.msra.mxu1 %v4590_v61 }
 0x6ca   : > { %4266 = vmatprep.subr.bf16.mxu1 %v5088_v4 }
 0x6cc   : > { %4032 = vmatmul.mubr.msk.bf16.vlgmr.msra.gmra.mrb[24].mxu1 %vm1257_vm1, %v1364_v62  ;;  %v4599_v62 = vld [vmem:[#allocation7 + $0x60] ss:$8 sps:$4 sm:$0xff]  }
 0x6cd   : > { %4268 = vmatprep.mubr.msk.bf16.mxu1 %vm5089_vm0, %v5088_v4 }
 0x6d2   : > { %4267 = vmatpush3.bf16.xpose.msra.mxu1 %v1623_v0  ;;  %v4604_v0 = vld [vmem:[#allocation7 + $0x74] ss:$8 sps:$4 sm:$0xff]  }
 0x6d3   : > { %4272 = vmatprep.subr.bf16.mxu1 %v5088_v4 }
 0x6d9   : > { %4269 = vmatmul.mubr.msk.bf16.vlgmr.msra.gmra.mrb[28].mxu1 %vm1257_vm1, %v1616_v5 }
 0x6da   : > { %4273 = vmatpush3.bf16.msra.mxu1 %v1683_v10  ;;  %4274 = vmatprep.mubr.msk.bf16.mxu1 %vm5089_vm0, %v5088_v4 }
 0x6db   : > { %4278 = vmatprep.subr.bf16.mxu1 %v5088_v4 }
 0x797   : > { %v1544_v11 = vpop.f32.mrb[20].mxu1 }
 0x798   : > { %v1546_v3 = vpop.f32.mrb[21].mxu1 }
 0x799   : > { %v1548_v12 = vpop.f32.mrb[22].mxu1 }
 0x79a   : > { %v1549_v13 = vpop.f32.mrb[23].mxu1 }
 0x79b   : > { %v632_v13 = vsub.s32 3, %v5406_v6 }
 0x79f   : > { %v1608_v15 = vpop.f32.mrb[24].mxu1 }
 0x7a0   : > { %v5488_v18 = vadd.f32 %v1608_v15, %v1544_v11  ;;  %v1610_v19 = vpop.f32.mrb[25].mxu1 }
 0x7a1   : > { %v5490_v21 = vadd.f32 %v1610_v19, %v1546_v3  ;;  %v1612_v22 = vpop.f32.mrb[26].mxu1  ;;  %v633_v19 = vrot.slane %v5412_v8, %v632_v13 }
 0x7a2   : > { %v1613_v24 = vpop.f32.mrb[27].mxu1 }
 0x7a3   : > { %v1206_v22 = vadd.f32 %v5422_v14, %v633_v19  ;;  %v5527_v24 = vsub.s32 1, %v5406_v6 }
 0x7ac   : > { %v1659_v25 = vpop.f32.mrb[28].mxu1 }
 0x7ad   : > { %v4270_v26 = vpop.f32.mrb[29].mxu1  ;;  %v1665_v27 = vsel %vm1304_vm2, %v1659_v25, -inf }
 0x7ae   : > { %1666 = vmax.xlane.f32.xlu0 %v1665_v27  ;;  %v1662_v28 = vpop.f32.mrb[30].mxu1  ;;  %v625_v26 = vrot.slane %v5412_v8, %v5527_v24 }
 0x7af   : > { %v4271_v29 = vpop.f32.mrb[31].mxu1 }
 0x7b0   : > { %v1165_v14 = vadd.f32 %v5426_v20, %v625_v26 }
 0x7b2   : > { %v5539_v29 = vpack.c.bf16 %v1165_v14, %v1165_v14  ;;  %v4611_v14 = vld [vmem:[#allocation7 + $0xa0] ss:$8 sps:$4 sm:$0xff]  }
 0x83b   : > { %v1667_v30 = vpop.xlane.xlu0 %1666 }
 0x83c   : > { %v1668_v31 = vsub.f32 %v1659_v25, %v1667_v30  ;;  %v5529_v25 = vpack.c.bf16 %v1206_v22, %v1206_v22  ;;  %v640_v30 = vsub.s32 5, %v5406_v6 }
 0x83e   : > { %v1669_v32 = vmul.f32 1.442695, %v1668_v31  ;;  %v1981_v28 = vsel %vm1257_vm1, %v5529_v25, 0  ;;  %v641_v31 = vrot.slane %v5412_v8, %v640_v30  ;;  %v4613_v30 = vld [vmem:[#allocation7 + $0xa4] ss:$8 sps:$4 sm:$0xff]  }
 0x840   : > { %4829 = vpow2.f32 %v1669_v32  ;;  %v1247_v32 = vadd.f32 %v5443_v2, %v641_v31  ;;  %v4616_v31 = vld [vmem:[#allocation7 + $0xb4] ss:$8 sps:$4 sm:$0xff]  }
 0x84a   : > { %v4830_v33 = vpop.eup %4829 }
 0x84b   : > { %v1671_v34 = vsel %vm1304_vm2, %v4830_v33, 0.0 }
 0x84c   : > { %1672 = vadd.xlane.f32.xlu1 %v1671_v34 }
 0x85d   : > { %1798 = vrot.lane.b32.xlu1 %v5424_v16, %s5093_s12 }
 0x861   : > { %1796 = vrot.lane.b32.xlu1 %v5432_v23, %s5093_s12 }
 0x8d9   : > { %v1673_v39 = vpop.xlane.xlu1 %1672 }
 0x8da   : > { %4831 = vrcp.f32 %v1673_v39 }
 0x8dd   : > { %v1799_v42 = vpop.permute.xlu1 %1798 }
 0x8de   : > { %v1804_v16 = vsel %vm1257_vm1, %v1799_v42, 0 }
 0x8e1   : > { %v1797_v23 = vpop.permute.xlu1 %1796 }
 0x8e4   : > { %v4832_v40 = vpop.eup %4831 }
 0x8e5   : > { %v1675_v41 = vmul.f32 %v4832_v40, %v4830_v33  ;;  %v5547_v33 = vpack.c.bf16 %v1247_v32, %v1247_v32  ;;  %v4614_v32 = vld [vmem:[#allocation7 + $0xb0] ss:$8 sps:$4 sm:$0xff]  }
 0x8e7   : > { %v1676_v43 = vpack.c.bf16 %v1675_v41, %v1675_v41  ;;  %v2039_v38 = vsel %vm1320_vm3, %v5547_v33, 0 }
 0x8e9   : > { %4275 = vmatmul.mubr.msk.bf16.vlgmr.msra.gmra.mrb[32].mxu1 %vm1304_vm2, %v1676_v43 }
 0x8ea   : > { %4279 = vmatpush3.bf16.xpose.msra.mxu1 %v1804_v16  ;;  %4280 = vmatprep.mubr.msk.bf16.mxu1 %vm5089_vm0, %v5088_v4 }
 0x8eb   : > { %1934 = vmatprep.subr.bf16.mxu1 %v4601_v63 }
 0x8f1   : > { %4281 = vmatmul.mubr.msk.bf16.vlgmr.msra.gmra.mrb[36].mxu1 %vm1257_vm1, %v1797_v23 }
 0x8f2   : > { %1966 = vmatprep.mubr.bf16.mxu1 %v5092_v53  ;;  %1935 = vmatpush1.bf16.msra.mxu1 %v4599_v62 }
 0x8f3   : > { %1936 = vmatprep.subr.bf16.mxu1 %v4604_v0 }
 0x9bc   : > { %v1719_v44 = vpop.f32.mrb[32].mxu1 }
 0x9bd   : > { %v1725_v45 = vpack.c.bf16 %v1719_v44, %v1719_v44  ;;  %v4276_v46 = vpop.f32.mrb[33].mxu1 }
 0x9be   : > { %v1722_v47 = vpop.f32.mrb[34].mxu1  ;;  %v4607_v46 = vld [vmem:[#allocation7 + $0x84] ss:$8 sps:$4 sm:$0xff]  }
 0x9bf   : > { %v4277_v48 = vpop.f32.mrb[35].mxu1  ;;  %4039 = vmatmul.mubr.msk.bf16.vlgmr.msra.gmra.mrb[8].mxu0 %vm1257_vm1, %v1725_v45  ;;  %v4605_v45 = vld [vmem:[#allocation7 + $0x80] ss:$8 sps:$4 sm:$0xff]   ;;  %v4610_v47 = vld [vmem:[#allocation7 + $0x94] ss:$8 sps:$4 sm:$0xff]  }
 0x9c0   : > { %4286 = vmatprep.mubr.msk.bf16.mxu0 %vm5089_vm0, %v5088_v4  ;;  %v4608_v48 = vld [vmem:[#allocation7 + $0x90] ss:$8 sps:$4 sm:$0xff]  }
 0x9c4   : > { %v1840_v49 = vpop.f32.mrb[36].mxu1 }
 0x9c5   : > { %v4282_v50 = vpop.f32.mrb[37].mxu1  ;;  %v1846_v51 = vsel %vm1304_vm2, %v1840_v49, -inf }
 0x9c6   : > { %1847 = vmax.xlane.f32.xlu0 %v1846_v51  ;;  %v1843_v52 = vpop.f32.mrb[38].mxu1 }
 0x9c7   : > { %v4283_v54 = vpop.f32.mrb[39].mxu1 }
 0x9dc   : > { %1858 = vrot.lane.b32.xlu0 %v5448_v17, %s5093_s12  ;;  %v4602_v17 = vld [vmem:[#allocation7 + $0x70] ss:$8 sps:$4 sm:$0xff]  }
 0x9dd   : > { %1937 = vmatpush1.bf16.msra.mxu1 %v4602_v17 }
 0x9de   : > { %4296 = vmatprep.subr.bf16.mxu1 %v5088_v4 }
 0xa53   : > { %v1848_v55 = vpop.xlane.xlu0 %1847 }
 0xa54   : > { %v1849_v56 = vsub.f32 %v1840_v49, %v1848_v55 }
 0xa56   : > { %v1850_v57 = vmul.f32 1.442695, %v1849_v56 }
 0xa57   : > { %v1859_v58 = vpop.permute.xlu0 %1858 }
 0xa58   : > { %4833 = vpow2.f32 %v1850_v57  ;;  %v1864_v59 = vsel %vm1320_vm3, %v1859_v58, 0 }
 0xa59   : > { %4285 = vmatpush3.bf16.msra.mxu0 %v1864_v59 }
 0xa5a   : > { %4290 = vmatprep.subr.bf16.mxu0 %v5088_v4 }
 0xa62   : > { %v4834_v60 = vpop.eup %4833 }
 0xa63   : > { %v1852_v61 = vsel %vm1304_vm2, %v4834_v60, 0.0 }
 0xa64   : > { %1853 = vadd.xlane.f32.xlu1 %v1852_v61 }
 0xa92   : > { %v1787_v1 = vpop.f32.mrb[8].mxu0 }
 0xa93   : > { %v5516_v5 = vadd.f32 %v1787_v1, %v5488_v18  ;;  %v1789_v10 = vpop.f32.mrb[9].mxu0 }
 0xa94   : > { %v5519_v11 = vadd.f32 %v1789_v10, %v5490_v21  ;;  %v1791_v3 = vpop.f32.mrb[10].mxu0 }
 0xa95   : > { %v1792_v12 = vpop.f32.mrb[11].mxu0 }
 0xaf1   : > { %v1854_v15 = vpop.xlane.xlu1 %1853 }
 0xaf2   : > { %4835 = vrcp.f32 %v1854_v15 }
 0xafc   : > { %v4836_v18 = vpop.eup %4835 }
 0xafd   : > { %v1856_v21 = vmul.f32 %v4836_v18, %v4834_v60 }
 0xaff   : > { %v1857_v27 = vpack.c.bf16 %v1856_v21, %v1856_v21 }
 0xb01   : > { %4287 = vmatmul.mubr.msk.bf16.vlgmr.msra.gmra.mrb[12].mxu0 %vm1304_vm2, %v1857_v27 }
 0xb02   : > { %4291 = vmatpush3.bf16.xpose.msra.mxu0 %v1981_v28  ;;  %4292 = vmatprep.mubr.msk.bf16.mxu0 %vm5089_vm0, %v5088_v4 }
 0xb03   : > { %2109 = vmatprep.subr.bf16.mxu0 %v4607_v46 }
 0xb09   : > { %4293 = vmatmul.mubr.msk.bf16.vlgmr.msra.gmra.mrb[16].mxu0 %vm1257_vm1, %v5539_v29 }
 0xb0a   : > { %2141 = vmatprep.mubr.bf16.mxu0 %v5092_v53  ;;  %2110 = vmatpush1.bf16.msra.mxu0 %v4605_v45 }
 0xb0b   : > { %2111 = vmatprep.subr.bf16.mxu0 %v4610_v47 }
 0xb0e   : > { %2112 = vmatpush1.bf16.msra.mxu0 %v4608_v48 }
 0xb0f   : > { %4308 = vmatprep.subr.bf16.mxu0 %v5088_v4 }
 0xbd4   : > { %v1900_v34 = vpop.f32.mrb[12].mxu0 }
 0xbd5   : > { %v1906_v35 = vpack.c.bf16 %v1900_v34, %v1900_v34  ;;  %v4288_v36 = vpop.f32.mrb[13].mxu0 }
 0xbd6   : > { %v1903_v37 = vpop.f32.mrb[14].mxu0 }
 0xbd7   : > { %v4289_v20 = vpop.f32.mrb[15].mxu0  ;;  %4046 = vmatmul.mubr.msk.bf16.vlgmr.msra.gmra.mrb[40].mxu1 %vm1257_vm1, %v1906_v35 }
 0xbd8   : > { %4297 = vmatpush3.bf16.msra.mxu1 %v2039_v38  ;;  %4298 = vmatprep.mubr.msk.bf16.mxu1 %vm5089_vm0, %v5088_v4 }
 0xbd9   : > { %4302 = vmatprep.subr.bf16.mxu1 %v5088_v4 }
 0xbdc   : > { %v2017_v8 = vpop.f32.mrb[16].mxu0 }
 0xbdd   : > { %v4294_v2 = vpop.f32.mrb[17].mxu0  ;;  %v2023_v39 = vsel %vm1304_vm2, %v2017_v8, -inf }
 0xbde   : > { %2024 = vmax.xlane.f32.xlu0 %v2023_v39  ;;  %v2020_v40 = vpop.f32.mrb[18].mxu0 }
 0xbdf   : > { %v4295_v41 = vpop.f32.mrb[19].mxu0 }
 0xbf4   : > { %2153 = vrot.lane.b32.xlu0 %v5539_v29, %s5090_s8 }
 0xc6b   : > { %v2025_v42 = vpop.xlane.xlu0 %2024 }
 0xc6c   : > { %v2026_v43 = vsub.f32 %v2017_v8, %v2025_v42 }
 0xc6e   : > { %v2027_v16 = vmul.f32 1.442695, %v2026_v43 }
 0xc6f   : > { %v2154_v62 = vpop.permute.xlu0 %2153 }
 0xc70   : > { %4837 = vpow2.f32 %v2027_v16 }
 0xc7a   : > { %v4838_v23 = vpop.eup %4837 }
 0xc7b   : > { %v2029_v44 = vsel %vm1304_vm2, %v4838_v23, 0.0 }
 0xc7c   : > { %2030 = vadd.xlane.f32.xlu1 %v2029_v44 }
 0xc8d   : > { %2156 = vrot.lane.b32.xlu1 %v5529_v25, %s5090_s8 }
 0xcaa   : > { %v1968_v49 = vpop.f32.mrb[40].mxu1 }
 0xcab   : > { %v1975_v50 = vadd.f32 %v1968_v49, %v5516_v5  ;;  %v1970_v51 = vpop.f32.mrb[41].mxu1 }
 0xcac   : > { %v1976_v52 = vadd.f32 %v1970_v51, %v5519_v11  ;;  %v1972_v54 = vpop.f32.mrb[42].mxu1 }
 0xcad   : > { %v1973_v55 = vpop.f32.mrb[43].mxu1 }
 0xd09   : > { %v2031_v56 = vpop.xlane.xlu1 %2030 }
 0xd0a   : > { %4839 = vrcp.f32 %v2031_v56 }
 0xd0d   : > { %v2157_v59 = vpop.permute.xlu1 %2156 }
 0xd0e   : > { %v2162_v61 = vsel %vm1257_vm1, %v2157_v59, 0 }
 0xd14   : > { %v4840_v57 = vpop.eup %4839 }
 0xd15   : > { %v2033_v58 = vmul.f32 %v4840_v57, %v4838_v23 }
 0xd17   : > { %v2034_v60 = vpack.c.bf16 %v2033_v58, %v2033_v58 }
 0xd19   : > { %4299 = vmatmul.mubr.msk.bf16.vlgmr.msra.gmra.mrb[44].mxu1 %vm1304_vm2, %v2034_v60  ;;  %v4617_v60 = vld [vmem:[#allocation7 + $0xc0] ss:$8 sps:$4 sm:$0xff]  }
 0xd1a   : > { %4303 = vmatpush3.bf16.xpose.msra.mxu1 %v2162_v61  ;;  %4304 = vmatprep.mubr.msk.bf16.mxu1 %vm5089_vm0, %v5088_v4  ;;  %v4619_v61 = vld [vmem:[#allocation7 + $0xc4] ss:$8 sps:$4 sm:$0xff]  }
 0xd1b   : > { %2293 = vmatprep.subr.bf16.mxu1 %v4613_v30 }
 0xd21   : > { %4305 = vmatmul.mubr.msk.bf16.vlgmr.msra.gmra.mrb[48].mxu1 %vm1257_vm1, %v2154_v62  ;;  %v4620_v62 = vld [vmem:[#allocation7 + $0xd0] ss:$8 sps:$4 sm:$0xff]  }
 0xd22   : > { %2325 = vmatprep.mubr.bf16.mxu1 %v5092_v53  ;;  %2294 = vmatpush1.bf16.msra.mxu1 %v4611_v14 }
 0xd23   : > { %2295 = vmatprep.subr.bf16.mxu1 %v4616_v31 }
 0xd26   : > { %2296 = vmatpush1.bf16.msra.mxu1 %v4614_v32 }
 0xd27   : > { %4320 = vmatprep.subr.bf16.mxu1 %v5088_v4 }
 0xdec   : > { %v2075_v63 = vpop.f32.mrb[44].mxu1 }
 0xded   : > { %v2081_v0 = vpack.c.bf16 %v2075_v63, %v2075_v63  ;;  %v4300_v17 = vpop.f32.mrb[45].mxu1 }
 0xdee   : > { %v2078_v1 = vpop.f32.mrb[46].mxu1 }
 0xdef   : > { %v4301_v5 = vpop.f32.mrb[47].mxu1  ;;  %4053 = vmatmul.mubr.msk.bf16.vlgmr.msra.gmra.mrb[20].mxu0 %vm1257_vm1, %v2081_v0 }
 0xdf0   : > { %4310 = vmatprep.mubr.msk.bf16.mxu0 %vm5089_vm0, %v5088_v4 }
 0xdf4   : > { %v2198_v10 = vpop.f32.mrb[48].mxu1 }
 0xdf5   : > { %v4306_v11 = vpop.f32.mrb[49].mxu1  ;;  %v2204_v3 = vsel %vm1304_vm2, %v2198_v10, -inf }
 0xdf6   : > { %2205 = vmax.xlane.f32.xlu1 %v2204_v3  ;;  %v2201_v12 = vpop.f32.mrb[50].mxu1 }
 0xdf7   : > { %v4307_v15 = vpop.f32.mrb[51].mxu1 }
 0xe07   : > { %2217 = vrot.lane.b32.xlu1 %v5547_v33, %s5090_s8 }
 0xe0b   : > { %2336 = vrot.lane.b32.xlu1 %v5539_v29, %s5091_s16 }
 0xe83   : > { %v2206_v19 = vpop.xlane.xlu1 %2205 }
 0xe84   : > { %v2207_v22 = vsub.f32 %v2198_v10, %v2206_v19 }
 0xe86   : > { %v2208_v18 = vmul.f32 1.442695, %v2207_v22 }
 0xe87   : > { %v2218_v21 = vpop.permute.xlu1 %2217 }
 0xe88   : > { %4841 = vpow2.f32 %v2208_v18  ;;  %v2223_v26 = vsel %vm1320_vm3, %v2218_v21, 0 }
 0xe89   : > { %4309 = vmatpush3.bf16.msra.mxu0 %v2223_v26 }
 0xe8a   : > { %4314 = vmatprep.subr.bf16.mxu0 %v5088_v4 }
 0xe8b   : > { %v2337_v43 = vpop.permute.xlu1 %2336 }
 0xe92   : > { %v4842_v27 = vpop.eup %4841 }
 0xe93   : > { %v2210_v28 = vsel %vm1304_vm2, %v4842_v27, 0.0 }
 0xe94   : > { %2211 = vadd.xlane.f32.xlu0 %v2210_v28 }
 0xeaa   : > { %2338 = vrot.lane.b32.xlu0 %v5529_v25, %s5091_s16 }
 0xec2   : > { %v2143_v34 = vpop.f32.mrb[20].mxu0 }
 0xec3   : > { %v2150_v35 = vadd.f32 %v2143_v34, %v1975_v50  ;;  %v2145_v36 = vpop.f32.mrb[21].mxu0 }
 0xec4   : > { %v2151_v37 = vadd.f32 %v2145_v36, %v1976_v52  ;;  %v2147_v20 = vpop.f32.mrb[22].mxu0 }
 0xec5   : > { %v2148_v38 = vpop.f32.mrb[23].mxu0 }
 0xf21   : > { %v2212_v8 = vpop.xlane.xlu0 %2211 }
 0xf22   : > { %4843 = vrcp.f32 %v2212_v8  ;;  %v4623_v8 = vld [vmem:[#allocation7 + $0xe0] ss:$8 sps:$4 sm:$0xff]  }
 0xf25   : > { %v2339_v40 = vpop.permute.xlu0 %2338 }
 0xf26   : > { %v2344_v42 = vsel %vm1257_vm1, %v2339_v40, 0  ;;  %v4626_v40 = vld [vmem:[#allocation7 + $0xf0] ss:$8 sps:$4 sm:$0xff]  }
 0xf2c   : > { %v4844_v2 = vpop.eup %4843 }
 0xf2d   : > { %v2214_v39 = vmul.f32 %v4844_v2, %v4842_v27  ;;  %v4625_v2 = vld [vmem:[#allocation7 + $0xe4] ss:$8 sps:$4 sm:$0xff]  }
 0xf2f   : > { %v2215_v41 = vpack.c.bf16 %v2214_v39, %v2214_v39  ;;  %v4628_v39 = vld [vmem:[#allocation7 + $0xf4] ss:$8 sps:$4 sm:$0xff]  }
 0xf31   : > { %4311 = vmatmul.mubr.msk.bf16.vlgmr.msra.gmra.mrb[24].mxu0 %vm1304_vm2, %v2215_v41 }
 0xf32   : > { %4315 = vmatpush3.bf16.xpose.msra.mxu0 %v2344_v42  ;;  %4316 = vmatprep.mubr.msk.bf16.mxu0 %vm5089_vm0, %v5088_v4 }
 0xf33   : > { %2474 = vmatprep.subr.bf16.mxu0 %v4619_v61 }
 0xf39   : > { %4317 = vmatmul.mubr.msk.bf16.vlgmr.msra.gmra.mrb[28].mxu0 %vm1257_vm1, %v2337_v43 }
 0xf3a   : > { %2506 = vmatprep.mubr.bf16.mxu0 %v5092_v53  ;;  %2475 = vmatpush1.bf16.msra.mxu0 %v4617_v60 }
0x1004   : > { %v2259_v16 = vpop.f32.mrb[24].mxu0 }
0x1005   : > { %v2265_v23 = vpack.c.bf16 %v2259_v16, %v2259_v16  ;;  %v4312_v44 = vpop.f32.mrb[25].mxu0 }
0x1006   : > { %v2262_v45 = vpop.f32.mrb[26].mxu0 }
0x1007   : > { %v4313_v46 = vpop.f32.mrb[27].mxu0  ;;  %4060 = vmatmul.mubr.msk.bf16.vlgmr.msra.gmra.mrb[52].mxu1 %vm1257_vm1, %v2265_v23 }
0x1008   : > { %4322 = vmatprep.mubr.msk.bf16.mxu1 %vm5089_vm0, %v5088_v4 }
0x100c   : > { %v2380_v47 = vpop.f32.mrb[28].mxu0 }
0x100d   : > { %v4318_v48 = vpop.f32.mrb[29].mxu0  ;;  %v2386_v49 = vsel %vm1304_vm2, %v2380_v47, -inf }
0x100e   : > { %2387 = vmax.xlane.f32.xlu1 %v2386_v49  ;;  %v2383_v50 = vpop.f32.mrb[30].mxu0 }
0x100f   : > { %v4319_v51 = vpop.f32.mrb[31].mxu0 }
0x101f   : > { %2398 = vrot.lane.b32.xlu1 %v5547_v33, %s5091_s16 }
0x1023   : > { %2517 = vrot.lane.b32.xlu1 %v5539_v29, %s5093_s12  ;;  %v4622_v29 = vld [vmem:[#allocation7 + $0xd4] ss:$8 sps:$4 sm:$0xff]  }
0x1024   : > { %2476 = vmatprep.subr.bf16.mxu0 %v4622_v29 }
0x1025   : > { %2477 = vmatpush1.bf16.msra.mxu0 %v4620_v62 }
0x1026   : > { %4332 = vmatprep.subr.bf16.mxu0 %v5088_v4 }
0x109b   : > { %v2388_v52 = vpop.xlane.xlu1 %2387 }
0x109c   : > { %v2389_v54 = vsub.f32 %v2380_v47, %v2388_v52 }
0x109e   : > { %v2390_v55 = vmul.f32 1.442695, %v2389_v54  ;;  %v2698_v54 = vld [vmem:[%s5743_s4] sm:$0x3] }
0x109f   : > { %v2399_v56 = vpop.permute.xlu1 %2398 }
0x10a0   : > { %4845 = vpow2.f32 %v2390_v55  ;;  %v2404_v57 = vsel %vm1320_vm3, %v2399_v56, 0  ;;  %v2703_v55 = vrot.slane %v2698_v54, %v5415_v9 }
0x10a1   : > { %4321 = vmatpush3.bf16.msra.mxu1 %v2404_v57  ;;  %v2707_v57 = vrot.slane %v2698_v54, %v5527_v24 }
0x10a2   : > { %4326 = vmatprep.subr.bf16.mxu1 %v5088_v4 }
0x10a3   : > { %v2518_v22 = vpop.permute.xlu1 %2517 }
0x10aa   : > { %v4846_v58 = vpop.eup %4845 }
0x10ab   : > { %v2392_v59 = vsel %vm1304_vm2, %v4846_v58, 0.0 }
0x10ac   : > { %2393 = vadd.xlane.f32.xlu0 %v2392_v59 }
0x10c2   : > { %2519 = vrot.lane.b32.xlu0 %v5529_v25, %s5093_s12 }
0x10da   : > { %v2327_v63 = vpop.f32.mrb[52].mxu1 }
0x10db   : > { %v2334_v0 = vadd.f32 %v2327_v63, %v2150_v35  ;;  %v2329_v17 = vpop.f32.mrb[53].mxu1 }
0x10dc   : > { %v2335_v1 = vadd.f32 %v2329_v17, %v2151_v37  ;;  %v2331_v5 = vpop.f32.mrb[54].mxu1 }
0x10dd   : > { %v2332_v10 = vpop.f32.mrb[55].mxu1 }
0x1139   : > { %v2394_v11 = vpop.xlane.xlu0 %2393 }
0x113a   : > { %4847 = vrcp.f32 %v2394_v11  ;;  %v4629_v11 = vld [vmem:[#allocation8] ss:$16 sps:$4 sm:$0xff]  }
0x113d   : > { %v2520_v12 = vpop.permute.xlu0 %2519 }
0x113e   : > { %v2525_v19 = vsel %vm1257_vm1, %v2520_v12, 0  ;;  %v4634_v12 = vld [vmem:[#allocation8 + $0xc] ss:$16 sps:$4 sm:$0xff]  }
0x1144   : > { %v4848_v3 = vpop.eup %4847 }
0x1145   : > { %v2396_v25 = vmul.f32 %v4848_v3, %v4846_v58  ;;  %v4631_v3 = vld [vmem:[#allocation8 + $0x4] ss:$16 sps:$4 sm:$0xff]  }
0x1147   : > { %v2397_v15 = vpack.c.bf16 %v2396_v25, %v2396_v25  ;;  %v4632_v25 = vld [vmem:[#allocation8 + $0x8] ss:$16 sps:$4 sm:$0xff]  }
0x1149   : > { %4323 = vmatmul.mubr.msk.bf16.vlgmr.msra.gmra.mrb[56].mxu1 %vm1304_vm2, %v2397_v15  ;;  %v4637_v15 = vld [vmem:[#allocation8 + $0x24] ss:$16 sps:$4 sm:$0xff]  }
0x114a   : > { %4327 = vmatpush3.bf16.xpose.msra.mxu1 %v2525_v19  ;;  %4328 = vmatprep.mubr.msk.bf16.mxu1 %vm5089_vm0, %v5088_v4  ;;  %v4640_v19 = vld [vmem:[#allocation8 + $0x2c] ss:$16 sps:$4 sm:$0xff]  }
0x114b   : > { %2655 = vmatprep.subr.bf16.mxu1 %v4625_v2  ;;  %v4670_v2 = vld [vmem:[#allocation8 + $0xcc] ss:$16 sps:$4 sm:$0xff]  }
0x1151   : > { %4329 = vmatmul.mubr.msk.bf16.vlgmr.msra.gmra.mrb[60].mxu1 %vm1257_vm1, %v2518_v22  ;;  %v4635_v22 = vld [vmem:[#allocation8 + $0x20] ss:$16 sps:$4 sm:$0xff]  }
0x1152   : > { %2687 = vmatprep.mubr.bf16.mxu1 %v5092_v53  ;;  %2656 = vmatpush1.bf16.msra.mxu1 %v4623_v8  ;;  %v4667_v8 = vld [vmem:[#allocation8 + $0xc4] ss:$16 sps:$4 sm:$0xff]  }
0x1153   : > { %2657 = vmatprep.subr.bf16.mxu1 %v4628_v39  ;;  %v4665_v39 = vld [vmem:[#allocation8 + $0xc0] ss:$16 sps:$4 sm:$0xff]  }
0x1156   : > { %2658 = vmatpush1.bf16.msra.mxu1 %v4626_v40  ;;  %v4668_v40 = vld [vmem:[#allocation8 + $0xc8] ss:$16 sps:$4 sm:$0xff]  }
0x1157   : > { %3208 = vmatprep.subr.bf16.mxu1 %v4634_v12  ;;  %v4710_v12 = vld [vmem:[#allocation8 + $0x1a8] ss:$16 sps:$4 sm:$0xff]  }
0x121c   : > { %v2440_v18 = vpop.f32.mrb[56].mxu1 }
0x121d   : > { %v2446_v21 = vpack.c.bf16 %v2440_v18, %v2440_v18  ;;  %v4324_v26 = vpop.f32.mrb[57].mxu1  ;;  %v4638_v18 = vld [vmem:[#allocation8 + $0x28] ss:$16 sps:$4 sm:$0xff]  }
0x121e   : > { %v2443_v27 = vpop.f32.mrb[58].mxu1  ;;  %v4646_v26 = vld [vmem:[#allocation8 + $0x4c] ss:$16 sps:$4 sm:$0xff]  }
0x121f   : > { %v4325_v28 = vpop.f32.mrb[59].mxu1  ;;  %4067 = vmatmul.mubr.msk.bf16.vlgmr.msra.gmra.mrb[32].mxu0 %vm1257_vm1, %v2446_v21  ;;  %v4643_v21 = vld [vmem:[#allocation8 + $0x44] ss:$16 sps:$4 sm:$0xff]   ;;  %v4641_v27 = vld [vmem:[#allocation8 + $0x40] ss:$16 sps:$4 sm:$0xff]  }
0x1220   : > { %4334 = vmatprep.mubr.msk.bf16.mxu0 %vm5089_vm0, %v5088_v4  ;;  %v4644_v28 = vld [vmem:[#allocation8 + $0x48] ss:$16 sps:$4 sm:$0xff]  }
0x1224   : > { %v2561_v14 = vpop.f32.mrb[60].mxu1 }
0x1225   : > { %v4330_v30 = vpop.f32.mrb[61].mxu1  ;;  %v2567_v31 = vsel %vm1304_vm2, %v2561_v14, -inf }
0x1226   : > { %2568 = vmax.xlane.f32.xlu1 %v2567_v31  ;;  %v2564_v32 = vpop.f32.mrb[62].mxu1  ;;  %v4652_v30 = vld [vmem:[#allocation8 + $0x6c] ss:$16 sps:$4 sm:$0xff]   ;;  %v4647_v31 = vld [vmem:[#allocation8 + $0x60] ss:$16 sps:$4 sm:$0xff]  }
0x1227   : > { %v4331_v34 = vpop.f32.mrb[63].mxu1  ;;  %v4650_v32 = vld [vmem:[#allocation8 + $0x68] ss:$16 sps:$4 sm:$0xff]  }
0x1228   : > { %v4655_v34 = vld [vmem:[#allocation8 + $0x84] ss:$16 sps:$4 sm:$0xff]  }
0x1237   : > { %2579 = vrot.lane.b32.xlu1 %v5547_v33, %s5093_s12  ;;  %s5779_s12 = sld [smem:[#allocation18_spill]] }
0x12b3   : > { %v2569_v53 = vpop.xlane.xlu1 %2568 }
0x12b4   : > { %v2570_v35 = vsub.f32 %v2561_v14, %v2569_v53  ;;  %v4649_v14 = vld [vmem:[#allocation8 + $0x64] ss:$16 sps:$4 sm:$0xff]   ;;  %v4658_v53 = vld [vmem:[#allocation8 + $0x8c] ss:$16 sps:$4 sm:$0xff]  }
0x12b6   : > { %v2571_v36 = vmul.f32 1.442695, %v2570_v35  ;;  %v4653_v35 = vld [vmem:[#allocation8 + $0x80] ss:$16 sps:$4 sm:$0xff]  }
0x12b7   : > { %v2580_v37 = vpop.permute.xlu1 %2579 }
0x12b8   : > { %4849 = vpow2.f32 %v2571_v36  ;;  %v2585_v20 = vsel %vm1320_vm3, %v2580_v37, 0  ;;  %v4656_v36 = vld [vmem:[#allocation8 + $0x88] ss:$16 sps:$4 sm:$0xff]   ;;  %v4661_v37 = vld [vmem:[#allocation8 + $0xa4] ss:$16 sps:$4 sm:$0xff]  }
0x12b9   : > { %4333 = vmatpush3.bf16.msra.mxu0 %v2585_v20  ;;  %v4664_v20 = vld [vmem:[#allocation8 + $0xac] ss:$16 sps:$4 sm:$0xff]  }
0x12ba   : > { %3167 = vmatprep.subr.bf16.mxu0 %v4631_v3  ;;  %v4712_v3 = vld [vmem:[#allocation8 + $0x1ac] ss:$16 sps:$4 sm:$0xff]  }
0x12c2   : > { %v4850_v38 = vpop.eup %4849 }
0x12c3   : > { %v2573_v4 = vsel %vm1304_vm2, %v4850_v38, 0.0 }
0x12c4   : > { %2574 = vadd.xlane.f32.xlu0 %v2573_v4  ;;  %v4662_v4 = vld [vmem:[#allocation8 + $0xa8] ss:$16 sps:$4 sm:$0xff]  }
0x12f2   : > { %v2508_v33 = vpop.f32.mrb[32].mxu0 }
0x12f3   : > { %v2515_v41 = vadd.f32 %v2508_v33, %v2334_v0  ;;  %v2510_v42 = vpop.f32.mrb[33].mxu0  ;;  %v4857_v0 = vld [vmem:[%s5383_s20] sm:$0xff] }
0x12f4   : > { %v2516_v43 = vadd.f32 %v2510_v42, %v2335_v1  ;;  %v2512_v16 = vpop.f32.mrb[34].mxu0  ;;  %v4858_v1 = vld [vmem:[%s5383_s20 + $0x8] sm:$0xff]  ;;  %v4673_v33 = vld [vmem:[#allocation8 + $0xe4] ss:$16 sps:$4 sm:$0xff]   ;;  %v4671_v42 = vld [vmem:[#allocation8 + $0xe0] ss:$16 sps:$4 sm:$0xff]  }
0x12f5   : > { %v2513_v23 = vpop.f32.mrb[35].mxu0  ;;  %v4679_v16 = vld [vmem:[#allocation8 + $0x104] ss:$16 sps:$4 sm:$0xff]   ;;  %s4209_s20 = sshll.u32 %s5186_s14, 8  ;;  %s3784_s14 = scalar_lea.sflag [#allocation4], %s5377_s1 }
0x12f6   : > { %v4682_v23 = vld [vmem:[#allocation8 + $0x10c] ss:$16 sps:$4 sm:$0xff]  }
0x1351   : > { %v2575_v44 = vpop.xlane.xlu0 %2574 }
0x1352   : > { %4851 = vrcp.f32 %v2575_v44  ;;  %v4677_v44 = vld [vmem:[#allocation8 + $0x100] ss:$16 sps:$4 sm:$0xff]  }
0x135c   : > { %v4852_v45 = vpop.eup %4851 }
0x135d   : > { %v2577_v46 = vmul.f32 %v4852_v45, %v4850_v38  ;;  %v4659_v38 = vld [vmem:[#allocation8 + $0xa0] ss:$16 sps:$4 sm:$0xff]   ;;  %v4680_v45 = vld [vmem:[#allocation8 + $0x108] ss:$16 sps:$4 sm:$0xff]  }
0x135f   : > { %v2578_v47 = vpack.c.bf16 %v2577_v46, %v2577_v46  ;;  %v4685_v46 = vld [vmem:[#allocation8 + $0x124] ss:$16 sps:$4 sm:$0xff]  }
0x1361   : > { %4335 = vmatmul.mubr.msk.bf16.vlgmr.msra.gmra.mrb[36].mxu0 %vm1304_vm2, %v2578_v47  ;;  %v4688_v47 = vld [vmem:[#allocation8 + $0x12c] ss:$16 sps:$4 sm:$0xff]  }
0x1362   : > { %3168 = vmatpush1.bf16.msra.mxu0 %v4629_v11  ;;  %v4709_v11 = vld [vmem:[#allocation8 + $0x1a4] ss:$16 sps:$4 sm:$0xff]  }
0x1363   : > { %3169 = vmatprep.subr.bf16.mxu0 %v4637_v15  ;;  %v4713_v15 = vld [vmem:[#allocation8 + $0x1c0] ss:$16 sps:$4 sm:$0xff]  }
0x1366   : > { %3170 = vmatpush1.bf16.msra.mxu0 %v4635_v22  ;;  %v4716_v22 = vld [vmem:[#allocation8 + $0x1c8] ss:$16 sps:$4 sm:$0xff]  }
0x1367   : > { %3171 = vmatprep.subr.bf16.mxu0 %v4643_v21  ;;  %v4721_v21 = vld [vmem:[#allocation8 + $0x1e4] ss:$16 sps:$4 sm:$0xff]  }
0x136a   : > { %3172 = vmatpush1.bf16.msra.mxu0 %v4641_v27  ;;  %v4719_v27 = vld [vmem:[#allocation8 + $0x1e0] ss:$16 sps:$4 sm:$0xff]  }
0x136b   : > { %3173 = vmatprep.subr.bf16.mxu0 %v4649_v14  ;;  %v4727_v14 = vld [vmem:[#allocation10 + $0x4] ss:$8 sps:$4 sm:$0xff]  }
0x136e   : > { %3174 = vmatpush1.bf16.msra.mxu0 %v4647_v31 }
0x136f   : > { %3175 = vmatprep.subr.bf16.mxu0 %v4655_v34 }
0x1372   : > { %3176 = vmatpush1.bf16.msra.mxu0 %v4653_v35  ;;  %v2745_v35 = vld [vmem:[%s5745_s6] sm:$0x3] }
0x1373   : > { %3177 = vmatprep.subr.bf16.mxu0 %v4661_v37 }
0x1376   : > { %3178 = vmatpush1.bf16.msra.mxu0 %v4659_v38 }
0x1377   : > { %3179 = vmatprep.subr.bf16.mxu0 %v4667_v8  ;;  %v2750_v8 = vrot.slane %v2745_v35, %v5415_v9 }
0x137a   : > { %3180 = vmatpush1.bf16.msra.mxu0 %v4665_v39 }
0x137b   : > { %3181 = vmatprep.subr.bf16.mxu0 %v4673_v33 }
0x137e   : > { %3182 = vmatpush1.bf16.msra.mxu0 %v4671_v42 }
0x137f   : > { %3183 = vmatprep.subr.bf16.mxu0 %v4679_v16  ;;  %v4725_v16 = vld [vmem:[#allocation10] ss:$8 sps:$4 sm:$0xff]  }
0x1382   : > { %3184 = vmatpush1.bf16.msra.mxu0 %v4677_v44  ;;  %v4733_v44 = vld [vmem:[#allocation10 + $0x14] ss:$8 sps:$4 sm:$0xff]  }
0x1383   : > { %3185 = vmatprep.subr.bf16.mxu0 %v4685_v46  ;;  %v4731_v46 = vld [vmem:[#allocation10 + $0x10] ss:$8 sps:$4 sm:$0xff]  }
0x1434   : > { %v2621_v48 = vpop.f32.mrb[36].mxu0 }
0x1435   : > { %v2627_v49 = vpack.c.bf16 %v2621_v48, %v2621_v48  ;;  %v4336_v50 = vpop.f32.mrb[37].mxu0  ;;  %v4683_v48 = vld [vmem:[#allocation8 + $0x120] ss:$16 sps:$4 sm:$0xff]  }
0x1436   : > { %v2624_v51 = vpop.f32.mrb[38].mxu0  ;;  %3186 = vmatpush1.bf16.msra.mxu0 %v4683_v48  ;;  %v4739_v48 = vld [vmem:[#allocation10 + $0x24] ss:$8 sps:$4 sm:$0xff]  }
0x1437   : > { %v4337_v52 = vpop.f32.mrb[39].mxu0  ;;  %4074 = vmatmul.mubr.msk.bf16.vlgmr.msra.gmra.mrb[64].mxu1 %vm1257_vm1, %v2627_v49  ;;  %v4686_v49 = vld [vmem:[#allocation8 + $0x128] ss:$16 sps:$4 sm:$0xff]  }
0x1438   : > { %3209 = vmatpush1.bf16.msra.mxu1 %v4632_v25  ;;  %v4707_v25 = vld [vmem:[#allocation8 + $0x1a0] ss:$16 sps:$4 sm:$0xff]  }
0x1439   : > { %3210 = vmatprep.subr.bf16.mxu1 %v4640_v19  ;;  %v4715_v19 = vld [vmem:[#allocation8 + $0x1c4] ss:$16 sps:$4 sm:$0xff]  }
0x143c   : > { %3211 = vmatpush1.bf16.msra.mxu1 %v4638_v18  ;;  %v4718_v18 = vld [vmem:[#allocation8 + $0x1cc] ss:$16 sps:$4 sm:$0xff]  }
0x143d   : > { %3212 = vmatprep.subr.bf16.mxu1 %v4646_v26  ;;  %v4724_v26 = vld [vmem:[#allocation8 + $0x1ec] ss:$16 sps:$4 sm:$0xff]  }
0x1440   : > { %3213 = vmatpush1.bf16.msra.mxu1 %v4644_v28  ;;  %v4722_v28 = vld [vmem:[#allocation8 + $0x1e8] ss:$16 sps:$4 sm:$0xff]  }
0x1441   : > { %3214 = vmatprep.subr.bf16.mxu1 %v4652_v30  ;;  %v4730_v30 = vld [vmem:[#allocation10 + $0x104] ss:$8 sps:$4 sm:$0xff]  }
0x1444   : > { %3215 = vmatpush1.bf16.msra.mxu1 %v4650_v32 }
0x1445   : > { %3216 = vmatprep.subr.bf16.mxu1 %v4658_v53  ;;  %v2731_v53 = vld [vmem:[%s5744_s5] sm:$0x3] }
0x1446   : > { %v2740_v37 = vrot.slane %v2731_v53, %v5527_v24 }
0x1448   : > { %3217 = vmatpush1.bf16.msra.mxu1 %v4656_v36  ;;  %v2736_v36 = vrot.slane %v2731_v53, %v5415_v9  ;;  %v4791_v53 = vld [vmem:[#allocation10 + $0xb0] ss:$8 sps:$4 sm:$0xff]  }
0x1449   : > { %3218 = vmatprep.subr.bf16.mxu1 %v4664_v20 }
0x144c   : > { %3219 = vmatpush1.bf16.msra.mxu1 %v4662_v4 }
0x144d   : > { %3220 = vmatprep.subr.bf16.mxu1 %v4670_v2  ;;  %v2754_v2 = vrot.slane %v2745_v35, %v5527_v24  ;;  %v4794_v35 = vld [vmem:[#allocation10 + $0x1b0] ss:$8 sps:$4 sm:$0xff]  }
0x1450   : > { %3221 = vmatpush1.bf16.msra.mxu1 %v4668_v40 }
0x150a   : > { %v2689_v56 = vpop.f32.mrb[64].mxu1 }
0x150b   : > { %v2696_v58 = vadd.f32 %v2689_v56, %v2515_v41  ;;  %v2691_v59 = vpop.f32.mrb[65].mxu1  ;;  %v4676_v41 = vld [vmem:[#allocation8 + $0xec] ss:$16 sps:$4 sm:$0xff]  }
0x150c   : > { %v2697_v60 = vadd.f32 %v2691_v59, %v2516_v43  ;;  %v2693_v61 = vpop.f32.mrb[66].mxu1  ;;  %v4674_v43 = vld [vmem:[#allocation8 + $0xe8] ss:$16 sps:$4 sm:$0xff]   ;;  %3222 = vmatprep.subr.bf16.mxu1 %v4676_v41  ;;  %v4694_v59 = vld [vmem:[#allocation8 + $0x14c] ss:$16 sps:$4 sm:$0xff]  }
0x150d   : > { %v2710_v29 = vadd.f32 %v2703_v55, %v2696_v58  ;;  %v2694_v62 = vpop.f32.mrb[67].mxu1  ;;  %3223 = vmatpush1.bf16.msra.mxu1 %v4674_v43  ;;  %v4691_v58 = vld [vmem:[#allocation8 + $0x144] ss:$16 sps:$4 sm:$0xff]   ;;  %v4692_v61 = vld [vmem:[#allocation8 + $0x148] ss:$16 sps:$4 sm:$0xff]  }
0x150e   : > { %v2711_v63 = vadd.f32 %v2707_v57, %v2697_v60  ;;  %3224 = vmatprep.subr.bf16.mxu1 %v4682_v23  ;;  %v4689_v60 = vld [vmem:[#allocation8 + $0x140] ss:$16 sps:$4 sm:$0xff]   ;;  %3187 = vmatprep.subr.bf16.mxu0 %v4691_v58  ;;  %v4700_v62 = vld [vmem:[#allocation8 + $0x16c] ss:$16 sps:$4 sm:$0xff]  }
0x150f   : > { %v5626_v17 = vadd.f32 %v4857_v0, %v2710_v29  ;;  %3188 = vmatpush1.bf16.msra.mxu0 %v4689_v60  ;;  %v4697_v29 = vld [vmem:[#allocation8 + $0x164] ss:$16 sps:$4 sm:$0xff]   ;;  %v4698_v0 = vld [vmem:[#allocation8 + $0x168] ss:$16 sps:$4 sm:$0xff]  }
0x1510   : > { %v5629_v5 = vadd.f32 %v4858_v1, %v2711_v63  ;;  %v4695_v63 = vld [vmem:[#allocation8 + $0x160] ss:$16 sps:$4 sm:$0xff]   ;;  %3189 = vmatprep.subr.bf16.mxu0 %v4697_v29  ;;  %v4706_v1 = vld [vmem:[#allocation8 + $0x18c] ss:$16 sps:$4 sm:$0xff]  }
0x1511   : > { %3225 = vmatpush1.bf16.msra.mxu1 %v4680_v45  ;;  %v4728_v23 = vld [vmem:[#allocation10 + $0x100] ss:$8 sps:$4 sm:$0xff]   ;;  %v4736_v45 = vld [vmem:[#allocation10 + $0x114] ss:$8 sps:$4 sm:$0xff]   ;;  %v4754_v58 = vld [vmem:[#allocation10 + $0x144] ss:$8 sps:$4 sm:$0xff]  }
0x1512   : > { %v2714_v10 = vadd.f32 %v5629_v5, %v5626_v17  ;;  %3226 = vmatprep.subr.bf16.mxu1 %v4688_v47  ;;  %v4734_v47 = vld [vmem:[#allocation10 + $0x110] ss:$8 sps:$4 sm:$0xff]   ;;  %v4752_v60 = vld [vmem:[#allocation10 + $0x140] ss:$8 sps:$4 sm:$0xff]   ;;  %v4760_v29 = vld [vmem:[#allocation10 + $0x154] ss:$8 sps:$4 sm:$0xff]  }
0x1513   : > { %3190 = vmatpush1.bf16.msra.mxu0 %v4695_v63  ;;  %v4758_v63 = vld [vmem:[#allocation10 + $0x150] ss:$8 sps:$4 sm:$0xff]  }
0x1514   : > { %2715 = vadd.xlane.f32.xlu0 %v2714_v10  ;;  %v4704_v10 = vld [vmem:[#allocation8 + $0x188] ss:$16 sps:$4 sm:$0xff]  }
0x1515   : > { %3227 = vmatpush1.bf16.msra.mxu1 %v4686_v49  ;;  %v4742_v49 = vld [vmem:[#allocation10 + $0x124] ss:$8 sps:$4 sm:$0xff]  }
0x1516   : > { %3228 = vmatprep.subr.bf16.mxu1 %v4694_v59  ;;  %v4749_v59 = vld [vmem:[#allocation10 + $0x40] ss:$8 sps:$4 sm:$0xff]  }
0x1519   : > { %3229 = vmatpush1.bf16.msra.mxu1 %v4692_v61  ;;  %v4757_v61 = vld [vmem:[#allocation10 + $0x54] ss:$8 sps:$4 sm:$0xff]  }
0x151a   : > { %3230 = vmatprep.subr.bf16.mxu1 %v4700_v62  ;;  %v4755_v62 = vld [vmem:[#allocation10 + $0x50] ss:$8 sps:$4 sm:$0xff]  }
0x151d   : > { %3231 = vmatpush1.bf16.msra.mxu1 %v4698_v0  ;;  %v4763_v0 = vld [vmem:[#allocation10 + $0x64] ss:$8 sps:$4 sm:$0xff]  }
0x151e   : > { %3232 = vmatprep.subr.bf16.mxu1 %v4706_v1  ;;  %v4761_v1 = vld [vmem:[#allocation10 + $0x60] ss:$8 sps:$4 sm:$0xff]  }
0x1521   : > { %3233 = vmatpush1.bf16.msra.mxu1 %v4704_v10  ;;  %v4769_v10 = vld [vmem:[#allocation10 + $0x74] ss:$8 sps:$4 sm:$0xff]  }
0x1522   : > { %3234 = vmatprep.subr.bf16.mxu1 %v4712_v3  ;;  %v4767_v3 = vld [vmem:[#allocation10 + $0x70] ss:$8 sps:$4 sm:$0xff]  }
0x1525   : > { %3235 = vmatpush1.bf16.msra.mxu1 %v4710_v12  ;;  %v4775_v12 = vld [vmem:[#allocation10 + $0x84] ss:$8 sps:$4 sm:$0xff]  }
0x1526   : > { %3236 = vmatprep.subr.bf16.mxu1 %v4718_v18  ;;  %v4781_v18 = vld [vmem:[#allocation10 + $0x94] ss:$8 sps:$4 sm:$0xff]  }
0x1529   : > { %3237 = vmatpush1.bf16.msra.mxu1 %v4716_v22  ;;  %v4776_v22 = vld [vmem:[#allocation10 + $0x180] ss:$8 sps:$4 sm:$0xff]  }
0x152a   : > { %3238 = vmatprep.subr.bf16.mxu1 %v4724_v26  ;;  %v4779_v26 = vld [vmem:[#allocation10 + $0x90] ss:$8 sps:$4 sm:$0xff]  }
0x152d   : > { %3239 = vmatpush1.bf16.msra.mxu1 %v4722_v28  ;;  %v4787_v28 = vld [vmem:[#allocation10 + $0xa4] ss:$8 sps:$4 sm:$0xff]  }
0x152e   : > { %3694 = vmatprep.subr.bf16.mxu1 %v4730_v30  ;;  %v4785_v30 = vld [vmem:[#allocation10 + $0xa0] ss:$8 sps:$4 sm:$0xff]  }
0x15a1   : > { %v2716_v50 = vpop.xlane.xlu0 %2715 }
0x15a2   : > { %v2718_v51 = vmul.f32 0.00390625, %v2716_v50  ;;  %v4737_v50 = vld [vmem:[#allocation10 + $0x20] ss:$8 sps:$4 sm:$0xff]  }
0x15a4   : > { %v5634_v52 = vsub.f32 %v5626_v17, %v2718_v51  ;;  %v5637_v54 = vsub.f32 %v5629_v5, %v2718_v51  ;;  %v4703_v17 = vld [vmem:[#allocation8 + $0x184] ss:$16 sps:$4 sm:$0xff]   ;;  %v4701_v5 = vld [vmem:[#allocation8 + $0x180] ss:$16 sps:$4 sm:$0xff]  }
0x15a5   : > { %3191 = vmatprep.subr.bf16.mxu0 %v4703_v17  ;;  %v4740_v51 = vld [vmem:[#allocation10 + $0x120] ss:$8 sps:$4 sm:$0xff]   ;;  %v4766_v17 = vld [vmem:[#allocation10 + $0x164] ss:$8 sps:$4 sm:$0xff]  }
0x15a6   : > { %v2721_v55 = vmul.f32 %v5634_v52, %v5634_v52  ;;  %v2722_v56 = vmul.f32 %v5637_v54, %v5637_v54  ;;  %3192 = vmatpush1.bf16.msra.mxu0 %v4701_v5  ;;  %v4764_v5 = vld [vmem:[#allocation10 + $0x160] ss:$8 sps:$4 sm:$0xff]  }
0x15a7   : > { %3193 = vmatprep.subr.bf16.mxu0 %v4709_v11  ;;  %v4772_v11 = vld [vmem:[#allocation10 + $0x174] ss:$8 sps:$4 sm:$0xff]  }
0x15a8   : > { %v2723_v57 = vadd.f32 %v2722_v56, %v2721_v55  ;;  %v4743_v55 = vld [vmem:[#allocation10 + $0x30] ss:$8 sps:$4 sm:$0xff]  }
0x15a9   : > { %v4746_v56 = vld [vmem:[#allocation10 + $0x130] ss:$8 sps:$4 sm:$0xff]  }
0x15aa   : > { %2724 = vadd.xlane.f32.xlu0 %v2723_v57  ;;  %3194 = vmatpush1.bf16.msra.mxu0 %v4707_v25  ;;  %v4751_v57 = vld [vmem:[#allocation10 + $0x44] ss:$8 sps:$4 sm:$0xff]   ;;  %v4770_v25 = vld [vmem:[#allocation10 + $0x170] ss:$8 sps:$4 sm:$0xff]  }
0x15ab   : > { %3195 = vmatprep.subr.bf16.mxu0 %v4715_v19  ;;  %v4773_v19 = vld [vmem:[#allocation10 + $0x80] ss:$8 sps:$4 sm:$0xff]  }
0x15ae   : > { %3196 = vmatpush1.bf16.msra.mxu0 %v4713_v15  ;;  %v4778_v15 = vld [vmem:[#allocation10 + $0x184] ss:$8 sps:$4 sm:$0xff]  }
0x15af   : > { %3197 = vmatprep.subr.bf16.mxu0 %v4721_v21  ;;  %v4784_v21 = vld [vmem:[#allocation10 + $0x194] ss:$8 sps:$4 sm:$0xff]  }
0x15b2   : > { %3198 = vmatpush1.bf16.msra.mxu0 %v4719_v27  ;;  %v4782_v27 = vld [vmem:[#allocation10 + $0x190] ss:$8 sps:$4 sm:$0xff]  }
0x15b3   : > { %3653 = vmatprep.subr.bf16.mxu0 %v4727_v14  ;;  %v4790_v14 = vld [vmem:[#allocation10 + $0x1a4] ss:$8 sps:$4 sm:$0xff]  }
0x1637   : > { %v2725_v31 = vpop.xlane.xlu0 %2724 }
0x1638   : > { %v2726_v32 = vmul.f32 0.00390625, %v2725_v31  ;;  %v4788_v31 = vld [vmem:[#allocation10 + $0x1a0] ss:$8 sps:$4 sm:$0xff]  }
0x163a   : > { %v2727_v34 = vadd.f32 1e-05, %v2726_v32  ;;  %v4793_v32 = vld [vmem:[#allocation10 + $0xb4] ss:$8 sps:$4 sm:$0xff]  }
0x163c   : > { %4853 = vrsqrt.f32 %v2727_v34  ;;  %v4796_v34 = vld [vmem:[#allocation10 + $0x1b4] ss:$8 sps:$4 sm:$0xff]  }
0x1646   : > { %v4854_v20 = vpop.eup %4853 }
0x1647   : > { %v2729_v38 = vmul.f32 %v4854_v20, %v5634_v52  ;;  %v2730_v4 = vmul.f32 %v4854_v20, %v5637_v54  ;;  %v4745_v52 = vld [vmem:[#allocation10 + $0x34] ss:$8 sps:$4 sm:$0xff]   ;;  %v4797_v20 = vld [vmem:[#allocation10 + $0xc0] ss:$8 sps:$4 sm:$0xff]  }
0x1648   : > { %v4748_v54 = vld [vmem:[#allocation10 + $0x134] ss:$8 sps:$4 sm:$0xff]  }
0x1649   : > { %v2744_v39 = vmul.f32 %v2740_v37, %v2730_v4  ;;  %v2743_v40 = vmul.f32 %v2736_v36, %v2729_v38  ;;  %v4799_v36 = vld [vmem:[#allocation10 + $0xc4] ss:$8 sps:$4 sm:$0xff]   ;;  %v4800_v38 = vld [vmem:[#allocation10 + $0x1c0] ss:$8 sps:$4 sm:$0xff]   ;;  %v4805_v4 = vld [vmem:[#allocation10 + $0xd4] ss:$8 sps:$4 sm:$0xff]  }
0x164a   : > { %v4802_v37 = vld [vmem:[#allocation10 + $0x1c4] ss:$8 sps:$4 sm:$0xff]  }
0x164b   : > { %v5655_v33 = vadd.f32 %v2754_v2, %v2744_v39  ;;  %v5657_v41 = vadd.f32 %v2750_v8, %v2743_v40  ;;  %v4808_v8 = vld [vmem:[#allocation10 + $0x1d4] ss:$8 sps:$4 sm:$0xff]   ;;  %v4803_v2 = vld [vmem:[#allocation10 + $0xd0] ss:$8 sps:$4 sm:$0xff]   ;;  %v4811_v40 = vld [vmem:[#allocation10 + $0xe4] ss:$8 sps:$4 sm:$0xff]  }
0x164c   : > { %v4806_v39 = vld [vmem:[#allocation10 + $0x1d0] ss:$8 sps:$4 sm:$0xff]  }
0x164d   : > { %v2760_v42 = vpack.c.bf16 %v5655_v33, %v5655_v33  ;;  %v2759_v43 = vpack.c.bf16 %v5657_v41, %v5657_v41 }
0x164f   : > { %3199 = vmatprep.mubr.bf16.mxu0 %v2760_v42  ;;  %3240 = vmatprep.mubr.bf16.mxu1 %v2760_v42  ;;  %v4814_v42 = vld [vmem:[#allocation10 + $0x1e4] ss:$8 sps:$4 sm:$0xff]  }
0x1650   : > { %3200 = vmatmul.mubr.bf16.vlgmr.msra.gmra.mrb[40].mxu0 %v2759_v43  ;;  %3241 = vmatmul.mubr.bf16.vlgmr.msra.gmra.mrb[68].mxu1 %v2759_v43  ;;  %v4809_v43 = vld [vmem:[#allocation10 + $0xe0] ss:$8 sps:$4 sm:$0xff]  }
0x1651   : > { %3654 = vmatpush1.bf16.msra.mxu0 %v4725_v16  ;;  %3695 = vmatpush1.bf16.msra.mxu1 %v4728_v23  ;;  %v4812_v16 = vld [vmem:[#allocation10 + $0x1e0] ss:$8 sps:$4 sm:$0xff]   ;;  %v4817_v23 = vld [vmem:[#allocation10 + $0xf4] ss:$8 sps:$4 sm:$0xff]  }
0x1652   : > { %3655 = vmatprep.subr.bf16.mxu0 %v4733_v44  ;;  %3696 = vmatprep.subr.bf16.mxu1 %v4736_v45  ;;  %v4820_v44 = vld [vmem:[#allocation10 + $0x1f4] ss:$8 sps:$4 sm:$0xff]   ;;  %v4815_v45 = vld [vmem:[#allocation10 + $0xf0] ss:$8 sps:$4 sm:$0xff]  }
0x1655   : > { %3656 = vmatpush1.bf16.msra.mxu0 %v4731_v46  ;;  %3697 = vmatpush1.bf16.msra.mxu1 %v4734_v47  ;;  %v4818_v46 = vld [vmem:[#allocation10 + $0x1f0] ss:$8 sps:$4 sm:$0xff]   ;;  %v2825_v47 = vld [vmem:[%s5778_s17] sm:$0xf]  ;;  %s3798_s17 = sshll.u32 %s514_s15, 4  ;;  %s5697_s17 = int_to_ptr.vmem [resolvable:$true] %s3798_s17 }
0x1656   : > { %3657 = vmatprep.subr.bf16.mxu0 %v4739_v48  ;;  %3698 = vmatprep.subr.bf16.mxu1 %v4742_v49  ;;  %v2830_v48 = vrot.slane %v2825_v47, %v5415_v9  ;;  %v2838_v49 = vrot.slane %v2825_v47, %v628_v7  ;;  %s5001_s10 = scalar_lea.vmem %s5697_s17, 256 }
0x1657   : > { %p5002_p6 = scmp.ne.s32.totalorder %s5697_s17, %s5001_s10 }
0x1659   : > { %3658 = vmatpush1.bf16.msra.mxu0 %v4737_v50  ;;  %3699 = vmatpush1.bf16.msra.mxu1 %v4740_v51  ;;  %v2834_v50 = vrot.slane %v2825_v47, %v5527_v24  ;;  %v2842_v51 = vrot.slane %v2825_v47, %v632_v13  ;;  %p5003_p2 = pnand %p5002_p6, %p5783_p0 }
0x165a   : > { %3659 = vmatprep.subr.bf16.mxu0 %v4745_v52  ;;  %3700 = vmatprep.subr.bf16.mxu1 %v4748_v54 }
0x165b   : > { %p5004_p5 = pneg %p5003_p2 }
0x165d   : > { %3660 = vmatpush1.bf16.msra.mxu0 %v4743_v55  ;;  %3701 = vmatpush1.bf16.msra.mxu1 %v4746_v56 }
0x165e   : > { %3661 = vmatprep.subr.bf16.mxu0 %v4751_v57  ;;  %3702 = vmatprep.subr.bf16.mxu1 %v4754_v58 }
0x1661   : > { %3662 = vmatpush1.bf16.msra.mxu0 %v4749_v59  ;;  %3703 = vmatpush1.bf16.msra.mxu1 %v4752_v60 }
0x1662   : > { %3663 = vmatprep.subr.bf16.mxu0 %v4757_v61  ;;  %3704 = vmatprep.subr.bf16.mxu1 %v4760_v29 }
0x1665   : > { %3664 = vmatpush1.bf16.msra.mxu0 %v4755_v62  ;;  %3705 = vmatpush1.bf16.msra.mxu1 %v4758_v63 }
0x1666   : > { %3665 = vmatprep.subr.bf16.mxu0 %v4763_v0  ;;  %3706 = vmatprep.subr.bf16.mxu1 %v4766_v17 }
0x1669   : > { %3666 = vmatpush1.bf16.msra.mxu0 %v4761_v1  ;;  %3707 = vmatpush1.bf16.msra.mxu1 %v4764_v5 }
0x166a   : > { %3667 = vmatprep.subr.bf16.mxu0 %v4769_v10  ;;  %3708 = vmatprep.subr.bf16.mxu1 %v4772_v11  ;;  %v3321_v11 = vld [vmem:[%s5779_s12] sm:$0x3]  ;;  %s5782_s12 = sld [smem:[#allocation21_spill]] }
0x166d   : > { %3668 = vmatpush1.bf16.msra.mxu0 %v4767_v3  ;;  %3709 = vmatpush1.bf16.msra.mxu1 %v4770_v25  ;;  %v3326_v3 = vrot.slane %v3321_v11, %v5415_v9  ;;  %v3330_v25 = vrot.slane %v3321_v11, %v5527_v24 }
0x166e   : > { %3669 = vmatprep.subr.bf16.mxu0 %v4775_v12  ;;  %3710 = vmatprep.subr.bf16.mxu1 %v4778_v15 }
0x1670   : > { %s5695_s13 = scalar_lea.hbm %s5782_s12, %s4209_s20 }
0x1671   : > { %3670 = vmatpush1.bf16.msra.mxu0 %v4773_v19  ;;  %3711 = vmatpush1.bf16.msra.mxu1 %v4776_v22 }
0x1672   : > { %3671 = vmatprep.subr.bf16.mxu0 %v4781_v18  ;;  %3712 = vmatprep.subr.bf16.mxu1 %v4784_v21 }
0x1675   : > { %3672 = vmatpush1.bf16.msra.mxu0 %v4779_v26  ;;  %3713 = vmatpush1.bf16.msra.mxu1 %v4782_v27 }
0x1676   : > { %3673 = vmatprep.subr.bf16.mxu0 %v4787_v28  ;;  %3714 = vmatprep.subr.bf16.mxu1 %v4790_v14 }
0x1679   : > { %3674 = vmatpush1.bf16.msra.mxu0 %v4785_v30  ;;  %3715 = vmatpush1.bf16.msra.mxu1 %v4788_v31 }
0x167a   : > { %3675 = vmatprep.subr.bf16.mxu0 %v4793_v32  ;;  %3716 = vmatprep.subr.bf16.mxu1 %v4796_v34 }
0x167d   : > { %3676 = vmatpush1.bf16.msra.mxu0 %v4791_v53  ;;  %3717 = vmatpush1.bf16.msra.mxu1 %v4794_v35 }
0x167e   : > { %3677 = vmatprep.subr.bf16.mxu0 %v4799_v36  ;;  %3718 = vmatprep.subr.bf16.mxu1 %v4802_v37 }
0x1681   : > { %3678 = vmatpush1.bf16.msra.mxu0 %v4797_v20  ;;  %3719 = vmatpush1.bf16.msra.mxu1 %v4800_v38 }
0x1682   : > { %3679 = vmatprep.subr.bf16.mxu0 %v4805_v4  ;;  %3720 = vmatprep.subr.bf16.mxu1 %v4808_v8 }
0x1685   : > { %3680 = vmatpush1.bf16.msra.mxu0 %v4803_v2  ;;  %3721 = vmatpush1.bf16.msra.mxu1 %v4806_v39 }
0x1686   : > { %3681 = vmatprep.subr.bf16.mxu0 %v4811_v40  ;;  %3722 = vmatprep.subr.bf16.mxu1 %v4814_v42 }
0x1689   : > { %3682 = vmatpush1.bf16.msra.mxu0 %v4809_v43  ;;  %3723 = vmatpush1.bf16.msra.mxu1 %v4812_v16 }
0x168a   : > { %3683 = vmatprep.subr.bf16.mxu0 %v4817_v23  ;;  %3724 = vmatprep.subr.bf16.mxu1 %v4820_v44 }
0x168d   : > { %3684 = vmatpush1.bf16.msra.mxu0 %v4815_v45  ;;  %3725 = vmatpush1.bf16.msra.mxu1 %v4818_v46 }
0x1723   : > { %v3201_v52 = vpop.f32.mrb[40].mxu0  ;;  %v3242_v54 = vpop.f32.mrb[68].mxu1 }
0x1724   : > { %v3202_v55 = vadd.f32 %v3201_v52, %v2830_v48  ;;  %v3243_v56 = vadd.f32 %v3242_v54, %v2838_v49  ;;  %v3203_v57 = vpop.f32.mrb[41].mxu0  ;;  %v3244_v58 = vpop.f32.mrb[69].mxu1 }
0x1725   : > { %v3204_v59 = vadd.f32 %v3203_v57, %v2834_v50  ;;  %v3245_v60 = vadd.f32 %v3244_v58, %v2842_v51  ;;  %v3205_v61 = vpop.f32.mrb[42].mxu0  ;;  %v3246_v29 = vpop.f32.mrb[70].mxu1 }
0x1726   : > { %v3249_v62 = vmax.f32 %v3202_v55, 0.0  ;;  %v3251_v63 = vmax.f32 %v3243_v56, 0.0  ;;  %v3206_v0 = vpop.f32.mrb[43].mxu0  ;;  %v3247_v17 = vpop.f32.mrb[71].mxu1 }
0x1727   : > { %v3250_v7 = vmax.f32 %v3204_v59, 0.0  ;;  %v3252_v1 = vmax.f32 %v3245_v60, 0.0 }
0x1728   : > { %v3253_v6 = vpack.c.bf16 %v3249_v62, %v3249_v62  ;;  %v3255_v13 = vpack.c.bf16 %v3251_v63, %v3251_v63 }
0x1729   : > { %v3254_v5 = vpack.c.bf16 %v3250_v7, %v3250_v7  ;;  %v3256_v10 = vpack.c.bf16 %v3252_v1, %v3252_v1 }
0x172b   : > { %3685 = vmatprep.mubr.bf16.mxu0 %v3254_v5  ;;  %3726 = vmatprep.mubr.bf16.mxu1 %v3256_v10 }
0x172c   : > { %3686 = vmatmul.mubr.bf16.vlgmr.msra.gmra.mrb[44].mxu0 %v3253_v6  ;;  %3727 = vmatmul.mubr.bf16.vlgmr.msra.gmra.mrb[72].mxu1 %v3255_v13 }
0x17ff   : > { %v3687_v12 = vpop.f32.mrb[44].mxu0  ;;  %v3728_v15 = vpop.f32.mrb[72].mxu1 }
0x1800   : > { %v3688_v19 = vadd.f32 %v3687_v12, %v3326_v3  ;;  %v3689_v22 = vpop.f32.mrb[45].mxu0  ;;  %v3730_v18 = vpop.f32.mrb[73].mxu1 }
0x1801   : > { %v3690_v21 = vadd.f32 %v3689_v22, %v3330_v25  ;;  %v3691_v26 = vpop.f32.mrb[46].mxu0  ;;  %v3732_v27 = vpop.f32.mrb[74].mxu1 }
0x1802   : > { %v3729_v28 = vadd.f32 %v3728_v15, %v3688_v19  ;;  %v3692_v14 = vpop.f32.mrb[47].mxu0  ;;  %v3733_v30 = vpop.f32.mrb[75].mxu1 }
0x1803   : > { %v3731_v31 = vadd.f32 %v3730_v18, %v3690_v21 }
0x1804   : > { %v3735_v32 = vadd.f32 %v3729_v28, %v5657_v41  ;;  %v3767_v41 = vld [vmem:[%s5781_s24] sm:$0x3] }
0x1805   : > { %v3736_v34 = vadd.f32 %v3731_v31, %v5655_v33  ;;  %v3753_v33 = vld [vmem:[%s5780_s11] sm:$0x3]  ;;  %v3772_v45 = vrot.slane %v3767_v41, %v5415_v9  ;;  %v3776_v46 = vrot.slane %v3767_v41, %v5527_v24  ;;  %s5005_s11 = sshll.u32 %s5094_s30, 4  ;;  %s5006_s11 = int_to_ptr.vmem [resolvable:$false] %s5005_s11 }
0x1806   : > { %v3758_v42 = vrot.slane %v3753_v33, %v5415_v9  ;;  %v3762_v43 = vrot.slane %v3753_v33, %v5527_v24  ;;  %s5007_s19 = scalar_lea.vmem %s5006_s11, 512  ;;  %p5008_p10 = scmp.lt.s32.totalorder %s5697_s17, %s5006_s11 }
0x1807   : > { %v3737_v53 = vadd.f32 %v3736_v34, %v3735_v32  ;;  %p5009_p1 = scmp.lt.s32.totalorder %s5007_s19, %s5001_s10 }
0x1809   : > { %3738 = vadd.xlane.f32.xlu0 %v3737_v53  ;;  %p5010_p11 = por %p5009_p1, %p5008_p10 }
0x180b   : > { %p5011_p12 = pnand %p5010_p11, %p5004_p5 }
0x1896   : > { %v3739_v35 = vpop.xlane.xlu0 %3738 }
0x1897   : > { %v3740_v36 = vmul.f32 0.00390625, %v3739_v35 }
0x1899   : > { %v3741_v37 = vsub.f32 %v3735_v32, %v3740_v36  ;;  %v3742_v20 = vsub.f32 %v3736_v34, %v3740_v36 }
0x189b   : > { %v3743_v38 = vmul.f32 %v3741_v37, %v3741_v37  ;;  %v3744_v4 = vmul.f32 %v3742_v20, %v3742_v20 }
0x189d   : > { %v3745_v8 = vadd.f32 %v3744_v4, %v3743_v38 }
0x189f   : > { %3746 = vadd.xlane.f32.xlu1 %v3745_v8 }
0x192c   : > { %v3747_v2 = vpop.xlane.xlu1 %3746 }
0x192d   : > { %v3748_v39 = vmul.f32 0.00390625, %v3747_v2 }
0x192f   : > { %v3749_v40 = vadd.f32 1e-05, %v3748_v39 }
0x1931   : > { %4855 = vrsqrt.f32 %v3749_v40 }
0x193b   : > { %v4856_v16 = vpop.eup %4855 }
0x193c   : > { %v3751_v23 = vmul.f32 %v4856_v16, %v3741_v37  ;;  %v3752_v44 = vmul.f32 %v4856_v16, %v3742_v20 }
0x193e   : > { %v3765_v47 = vmul.f32 %v3758_v42, %v3751_v23  ;;  %v3766_v48 = vmul.f32 %v3762_v43, %v3752_v44 }
0x1940   : > { %v3779_v49 = vadd.f32 %v3772_v45, %v3765_v47  ;;  %v3780_v50 = vadd.f32 %v3776_v46, %v3766_v48 }
0x1942   : > { %3781 = vst [vmem:[%s514_s15] sm:$0xff] %v3779_v49  ;;  %3782 = vst [vmem:[%s514_s15 + $0x8] sm:$0xff] %v3780_v50 }
0x1943   : > { %5014 = shalt.err (!%p5011_p12)
}
0x1944   : > { %s5015_s1 = scalar_lea.hbm %s5695_s13, 256  ;;  %s5019_s20 = scalar_lea.hbm %s5782_s12, 512 }
0x1945   : > { %p5016_p13 = scmp.ne.s32.totalorder %s5695_s13, %s5015_s1  ;;  %p5020_p9 = scmp.lt.u32.totalorder %s5695_s13, %s5782_s12 }
0x1946   : > { %p5021_p4 = scmp.lt.u32.totalorder %s5019_s20, %s5015_s1  ;;  %p5023_p6 = scmp.lt.u32.totalorder %s5015_s1, %s5695_s13 }
0x1947   : > { %p5017_p3 = pnand %p5016_p13, %p5783_p0 }
0x1948   : > { %p5022_p8 = por %p5021_p4, %p5020_p9 }
0x1949   : > { %p5018_p7 = pneg %p5017_p3 }
0x194a   : > { %p5024_p2 = por %p5023_p6, %p5022_p8 }
0x194c   : > { %p5025_p5 = pnand %p5024_p2, %p5018_p7 }
0x194e   : > { %5028 = shalt.err (!%p5025_p5)
}
0x194f   : > { %4356 = dma.vmem_to_hbm [thread:$0]  (%p5783_p0), %s5697_s17, 256, %s5695_s13, %s3784_s14  }
0x1950 PF: > { %s3810_s16 = sand.u32 1, %s5063_s25   ;;  %p5784_p10 = scmp.ne.s32.totalorder %s5771_s29, 0 }
0x1951   : > { %p5785_p1 = scmp.ge.s32.totalorder %s5075_s28, 2  ;;  %s3811_s10 = scalar_lea.sflag [#allocation4], %s3810_s16 }
0x1953   : > { %p4376_p11 = pnand %p5785_p1, %p5784_p10 }
0x1955   : > { %5058 = dma.done.wait (!%p4376_p11), %s3811_s10, 256  }
0x1956   : > { %5060 = vsyncadd (!%p4376_p11), %s3811_s10, 4294967040  ;;  %p28_p12 = scmp.ge.s32.totalorder %s5301_s18, 4   ;;  %s5786_s25 = smov %s5067_s26 }
0x1957   : > { %s5787_s26 = smov %s5071_s27  ;;  %s5788_s27 = smov %s5312_s23 }
0x1958   : > { %s5789_s28 = smov %s5301_s18  ;;  %30 = sbr.rel (!%p28_p12) target bundleno = 14 (0xe), region = 133 }
0x195f   :  { %3816 = vsyncpa [#allocation3], 1 }
0x1960   :  { %3818 = vsyncpa [#allocation3 + $0x1], 1 }
0x1961   :  { %3819 = vsyncpa [#allocation6], 1 }
0x1962   :  { %3820 = vsyncpa [#allocation9], 1 }
0x1963   :  { %3821 = vsyncpa [#allocation4], 1 }
0x1964   :  { %3823 = vsyncpa [#allocation4 + $0x1], 1 }

</bundles_post_ra>
